<compile_context>
chip_gen: v5e
topology: v5e:2x2
jax: 0.10.0
libtpu: 0.0.40
codegen_flags: <defaults>
</compile_context>

<pallas_src>
import functools

import jax
import jax.numpy as jnp
from jax import lax
from jax.experimental import pallas as pl
from jax.experimental.pallas import tpu as pltpu


def _round_up(x, m):
    return (x + m - 1) // m * m


def _electra_embeddings_kernel(
    # scalar-prefetch refs (SMEM)
    wid_ref,      # (B*S_pad,) int32  word ids (flat)
    pid_ref,      # (B*S_pad,) int32  position ids (flat)
    # tiled / resident inputs
    tid_ref,      # (TILE_S, 1) int32    token-type ids (VMEM block)
    wtab_ref,     # (V, E)               word table (HBM, pl.ANY)
    ptab_ref,     # (P_eff, E)           position table (VMEM resident)
    ttab_ref,     # (T, E)               token-type table (VMEM)
    gamma_ref,    # (1, E)               LayerNorm weight
    beta_ref,     # (1, E)               LayerNorm bias
    # output
    out_ref,      # (TILE_S, E)
    # scratch
    wbuf_a,       # (TILE_S//2, E) table-dtype  gathered word rows, half 0
    wbuf_b,       # (TILE_S//2, E) table-dtype  gathered word rows, half 1
    ptbuf,        # (TILE_S, E)   f32           position + token-type embeddings
    sem,          # DMA semaphores, shape (2,)
    *,
    eps,
    contig_pos,
    pos_aligned,
):
    b = pl.program_id(0)
    j = pl.program_id(1)
    n_s_tiles = pl.num_programs(1)
    tile_s, e = out_ref.shape
    half = tile_s // 2
    base = (b * n_s_tiles + j) * tile_s      # flat offset into the SMEM id arrays

    # ---- 1. issue word-row gather DMAs for both half-tiles (unrolled issue loop)
    def issue(row0, dst, slot):
        def body(r, c):
            w = wid_ref[base + row0 + r]
            pltpu.make_async_copy(
                wtab_ref.at[pl.ds(w, 1)], dst.at[pl.ds(r, 1)], sem.at[slot]
            ).start()
            return c
        lax.fori_loop(0, half, body, 0, unroll=8)

    issue(0, wbuf_a, 0)
    issue(half, wbuf_b, 1)

    # ---- 2. token-type + position embeddings on the VPU while gathers are in flight
    tid = tid_ref[...]                                    # (TILE_S, 1) int32
    t_rows = ttab_ref.shape[0]
    if t_rows == 2:
        type_emb = jnp.where(
            tid == 0, ttab_ref[pl.ds(0, 1), :], ttab_ref[pl.ds(1, 1), :]
        ).astype(jnp.float32)
    else:
        type_emb = jnp.where(tid == 0, ttab_ref[pl.ds(0, 1), :],
                             jnp.zeros((1, e), ttab_ref.dtype))
        for t in range(1, t_rows):
            type_emb = jnp.where(tid == t, ttab_ref[pl.ds(t, 1), :], type_emb)
        type_emb = type_emb.astype(jnp.float32)

    if contig_pos:
        # default arange positions: one contiguous slice of the resident table
        pos0 = pid_ref[base]
        if pos_aligned:
            pos0 = pl.multiple_of(pos0, 8)
        ptbuf[...] = ptab_ref[pl.ds(pos0, tile_s), :].astype(jnp.float32) + type_emb
    else:
        # general position ids: per-row dynamic VMEM slice gather (no DMAs)
        def gpos(r, c):
            p = pid_ref[base + r]
            ptbuf[pl.ds(r, 1), :] = ptab_ref[pl.ds(p, 1), :].astype(jnp.float32)
            return c
        lax.fori_loop(0, tile_s, gpos, 0, unroll=8)
        ptbuf[...] = ptbuf[...] + type_emb

    # ---- 3./4. per-half: single accumulated-byte drain, sum + LayerNorm + affine
    inv_e = 1.0 / e
    g = gamma_ref[...].astype(jnp.float32)                # (1, E)
    bt = beta_ref[...].astype(jnp.float32)

    def ln_half(row0, wsrc, slot):
        # one wait whose descriptor byte-count equals the `half` row copies
        # issued on this semaphore slot (all (1, E) of the table dtype)
        pltpu.make_async_copy(
            wtab_ref.at[pl.ds(0, half)], wsrc, sem.at[slot]
        ).wait()
        x = wsrc[...].astype(jnp.float32) + ptbuf[pl.ds(row0, half), :]
        mean = jnp.sum(x, axis=-1, keepdims=True) * inv_e
        xc = x - mean
        var = jnp.sum(xc * xc, axis=-1, keepdims=True) * inv_e
        y = xc * lax.rsqrt(var + eps) * g + bt
        out_ref[pl.ds(row0, half), :] = y.astype(out_ref.dtype)

    ln_half(0, wbuf_a, 0)        # overlaps with half-1's remaining DMA flight
    ln_half(half, wbuf_b, 1)

    # TODO(synk): nn.Dropout is identity at inference time; no RNG mask applied.


def electra_embeddings(input_ids, token_type_ids=None, position_ids=None, *,
                       params, past_key_values_length=0, tile_s=None,
                       out_dtype=None):
    """input_ids: (B, S) int32. Returns (B, S, E) LayerNorm'd embeddings."""
    B, S = input_ids.shape
    wtab = jnp.asarray(params["word_embeddings"])          # keep stored dtype
    ptab = jnp.asarray(params["position_embeddings"])
    ttab = jnp.asarray(params["token_type_embeddings"])
    gamma = jnp.asarray(params["ln_gamma"]).reshape(1, -1)
    beta = jnp.asarray(params["ln_beta"]).reshape(1, -1)
    eps = float(params["ln_eps"])

    V, E = wtab.shape
    P = ptab.shape[0]
    T = ttab.shape[0]
    if out_dtype is None:
        out_dtype = wtab.dtype

    past = int(past_key_values_length)
    contig_pos = position_ids is None

    if token_type_ids is None:
        token_type_ids = jnp.zeros((B, S), jnp.int32)

    # tile: multiple of 16 rows so each half-tile is a multiple of 8 sublanes
    if tile_s is None:
        tile_s = min(512, _round_up(S, 16))
    tile_s = max(16, _round_up(int(tile_s), 16))
    S_pad = _round_up(S, tile_s)
    n_s_tiles = S_pad // tile_s

    def pad_ids(x):
        x = jnp.asarray(x, jnp.int32)
        return jnp.pad(x, ((0, 0), (0, S_pad - S)))

    # clamp once in the wrapper (cheap) so in-kernel DMAs / slices never go OOB
    wids = jnp.clip(pad_ids(input_ids), 0, V - 1).reshape(-1)

    if contig_pos:
        position_ids = jnp.broadcast_to(
            jnp.arange(past, past + S, dtype=jnp.int32), (B, S))
        pids = pad_ids(position_ids).reshape(-1)
        # pad the resident position table so the contiguous slice read for the
        # padded tile tail stays in bounds
        need = past + S_pad
        if need > P:
            ptab = jnp.pad(ptab, ((0, need - P), (0, 0)))
    else:
        pids = jnp.clip(pad_ids(position_ids), 0, P - 1).reshape(-1)
    P_eff = ptab.shape[0]

    tids = pad_ids(token_type_ids).reshape(B, S_pad, 1)

    kernel = functools.partial(
        _electra_embeddings_kernel,
        eps=eps,
        contig_pos=contig_pos,
        pos_aligned=contig_pos and (past % 8 == 0),
    )

    grid_spec = pltpu.PrefetchScalarGridSpec(
        num_scalar_prefetch=2,
        grid=(B, n_s_tiles),
        in_specs=[
            pl.BlockSpec((None, tile_s, 1), lambda b, j, wid, pid: (b, j, 0)),  # type ids
            pl.BlockSpec(memory_space=pl.ANY),                                  # word tab (HBM)
            pl.BlockSpec((P_eff, E), lambda b, j, wid, pid: (0, 0)),            # pos tab (VMEM)
            pl.BlockSpec((T, E), lambda b, j, wid, pid: (0, 0)),                # type tab
            pl.BlockSpec((1, E), lambda b, j, wid, pid: (0, 0)),                # gamma
            pl.BlockSpec((1, E), lambda b, j, wid, pid: (0, 0)),                # beta
        ],
        out_specs=pl.BlockSpec((None, tile_s, E), lambda b, j, wid, pid: (b, j, 0)),
        scratch_shapes=[
            pltpu.VMEM((tile_s // 2, E), wtab.dtype),   # gathered word rows, half 0
            pltpu.VMEM((tile_s // 2, E), wtab.dtype),   # gathered word rows, half 1
            pltpu.VMEM((tile_s, E), jnp.float32),       # position + token-type sum
            pltpu.SemaphoreType.DMA((2,)),
        ],
    )

    out = pl.pallas_call(
        kernel,
        out_shape=jax.ShapeDtypeStruct((B, S_pad, E), out_dtype),
        grid_spec=grid_spec,
        compiler_params=pltpu.CompilerParams(
            dimension_semantics=("parallel", "parallel"),
            vmem_limit_bytes=32 * 1024 * 1024),
    )(wids, pids, tids, wtab, ptab, ttab, gamma, beta)

    return out[:, :S, :]
    # TODO(synk): inputs_embeds path of the PyTorch module (bypassing the word
    # lookup) is not implemented in this gather kernel.


def init_params(key, vocab_size, embedding_size, max_position_embeddings,
                type_vocab_size, pad_token_id, layer_norm_eps):
    k1, k2, k3 = jax.random.split(key, 3)
    word = 0.02 * jax.random.normal(k1, (vocab_size, embedding_size), jnp.float32)
    # nn.Embedding(padding_idx=...) zero-initializes the padding row
    word = word.at[pad_token_id].set(0.0)
    pos = 0.02 * jax.random.normal(k2, (max_position_embeddings, embedding_size), jnp.float32)
    typ = 0.02 * jax.random.normal(k3, (type_vocab_size, embedding_size), jnp.float32)
    return {
        "word_embeddings": word,
        "position_embeddings": pos,
        "token_type_embeddings": typ,
        "ln_gamma": jnp.ones((1, embedding_size), jnp.float32),
        "ln_beta": jnp.zeros((1, embedding_size), jnp.float32),
        "ln_eps": layer_norm_eps,
    }


def reference(input_ids, token_type_ids, position_ids, params):
    x = (params["word_embeddings"][input_ids]
         + params["token_type_embeddings"][token_type_ids]
         + params["position_embeddings"][position_ids])
    mean = jnp.mean(x, axis=-1, keepdims=True)
    var = jnp.mean((x - mean) ** 2, axis=-1, keepdims=True)
    y = (x - mean) * jax.lax.rsqrt(var + params["ln_eps"])
    return y * params["ln_gamma"][0] + params["ln_beta"][0]


if __name__ == "__main__":
    # small ELECTRA-ish config
    vocab_size = 128
    embedding_size = 128
    max_position_embeddings = 64
    type_vocab_size = 2
    pad_token_id = 0
    layer_norm_eps = 1e-12
    B, S = 2, 8

    key = jax.random.PRNGKey(0)
    kp, ki, kt = jax.random.split(key, 3)
    params = init_params(kp, vocab_size, embedding_size, max_position_embeddings,
                         type_vocab_size, pad_token_id, layer_norm_eps)

    input_ids = jax.random.randint(ki, (B, S), 0, vocab_size, dtype=jnp.int32)
    token_type_ids = jax.random.randint(kt, (B, S), 0, type_vocab_size, dtype=jnp.int32)
    position_ids = jnp.broadcast_to(jnp.arange(S, dtype=jnp.int32), (B, S))

    # default (contiguous-position) path: position_ids=None -> arange inside wrapper
    out = electra_embeddings(input_ids, token_type_ids, position_ids=None, params=params)
    out = jax.block_until_ready(out)

    ref = reference(input_ids, token_type_ids, position_ids, params)
    assert out.shape == (B, S, embedding_size)
    assert jnp.allclose(out, ref, atol=1e-4, rtol=1e-4), "mismatch vs reference (contig)"

    # explicit-position-ids (general gather) path
    out2 = electra_embeddings(input_ids, token_type_ids, position_ids=position_ids,
                              params=params)
    out2 = jax.block_until_ready(out2)
    assert jnp.allclose(out2, ref, atol=1e-4, rtol=1e-4), "mismatch vs reference (gather)"

    print("KERNEL_OK")
</pallas_src>

<mosaic_0001>
module attributes {stable_mosaic.version = 11 : i64} {
  func.func @_electra_embeddings_kernel(%arg0: i32, %arg1: i32, %arg2: memref<32xi32, #tpu.memory_space<smem>>, %arg3: memref<32xi32, #tpu.memory_space<smem>>, %arg4: memref<1x16x1xi32, #tpu.memory_space<vmem>>, %arg5: memref<128x128xf32, #tpu.memory_space<any>>, %arg6: memref<64x128xf32, #tpu.memory_space<vmem>>, %arg7: memref<2x128xf32, #tpu.memory_space<vmem>>, %arg8: memref<1x128xf32, #tpu.memory_space<vmem>>, %arg9: memref<1x128xf32, #tpu.memory_space<vmem>>, %arg10: memref<1x16x128xf32, #tpu.memory_space<vmem>>, %arg11: memref<8x128xf32, #tpu.memory_space<vmem>>, %arg12: memref<8x128xf32, #tpu.memory_space<vmem>>, %arg13: memref<16x128xf32, #tpu.memory_space<vmem>>, %arg14: memref<2x!tpu.dma_semaphore, #tpu.memory_space<semaphore_mem>>) attributes {dimension_semantics = [#tpu.dimension_semantics<parallel>, #tpu.dimension_semantics<parallel>], iteration_bounds = array<i64: 2, 1>, scalar_prefetch = 2 : i64, scratch_operands = 4 : i64, tpu.core_type = #tpu.core_type<tc>, window_params = [{transform_indices = @transform_0, window_bounds = array<i64: 1, 16, 1>}, {}, {pipeline_mode = #tpu.pipeline_mode<synchronous>, transform_indices = @transform_2, window_bounds = array<i64: 64, 128>}, {pipeline_mode = #tpu.pipeline_mode<synchronous>, transform_indices = @transform_3, window_bounds = array<i64: 2, 128>}, {pipeline_mode = #tpu.pipeline_mode<synchronous>, transform_indices = @transform_4, window_bounds = array<i64: 1, 128>}, {pipeline_mode = #tpu.pipeline_mode<synchronous>, transform_indices = @transform_5, window_bounds = array<i64: 1, 128>}, {transform_indices = @transform_6, window_bounds = array<i64: 1, 16, 128>}]} {
    %c1_i32 = arith.constant 1 : i32
    %0 = arith.muli %arg0, %c1_i32 : i32
    %1 = arith.addi %0, %arg1 : i32
    %c16_i32 = arith.constant 16 : i32
    %2 = arith.muli %1, %c16_i32 : i32
    %c0_i32 = arith.constant 0 : i32
    %c0_i32_0 = arith.constant 0 : i32
    %3 = arith.addi %2, %c0_i32_0 : i32
    %4 = arith.addi %3, %c0_i32 : i32
    %5 = arith.index_cast %4 : i32 to index
    %6 = memref.load %arg2[%5] : memref<32xi32, #tpu.memory_space<smem>>
    %c0_i32_1 = arith.constant 0 : i32
    %c0_i32_2 = arith.constant 0 : i32
    %7 = tpu.memref_slice %arg5[%6, %c0_i32_2] : memref<128x128xf32, #tpu.memory_space<any>> -> memref<1x128xf32, #tpu.memory_space<any>>
    %c0_i32_3 = arith.constant 0 : i32
    %8 = tpu.memref_slice %arg11[%c0_i32, %c0_i32_3] : memref<8x128xf32, #tpu.memory_space<vmem>> -> memref<1x128xf32, #tpu.memory_space<vmem>>
    %9 = tpu.memref_slice %arg14[%c0_i32_1] : memref<2x!tpu.dma_semaphore, #tpu.memory_space<semaphore_mem>> -> memref<1x!tpu.dma_semaphore, #tpu.memory_space<semaphore_mem>>
    %10 = tpu.memref_squeeze %9 : memref<1x!tpu.dma_semaphore, #tpu.memory_space<semaphore_mem>> -> memref<!tpu.dma_semaphore, #tpu.memory_space<semaphore_mem>>
    tpu.enqueue_dma source(%7 : memref<1x128xf32, #tpu.memory_space<any>>) target(%8 : memref<1x128xf32, #tpu.memory_space<vmem>>) target_semaphore(%10 : memref<!tpu.dma_semaphore, #tpu.memory_space<semaphore_mem>>)
    %c1_i32_4 = arith.constant 1 : i32
    %c0_i32_5 = arith.constant 0 : i32
    %11 = arith.addi %2, %c0_i32_5 : i32
    %12 = arith.addi %11, %c1_i32_4 : i32
    %13 = arith.index_cast %12 : i32 to index
    %14 = memref.load %arg2[%13] : memref<32xi32, #tpu.memory_space<smem>>
    %c0_i32_6 = arith.constant 0 : i32
    %c0_i32_7 = arith.constant 0 : i32
    %15 = tpu.memref_slice %arg5[%14, %c0_i32_7] : memref<128x128xf32, #tpu.memory_space<any>> -> memref<1x128xf32, #tpu.memory_space<any>>
    %c0_i32_8 = arith.constant 0 : i32
    %16 = tpu.memref_slice %arg11[%c1_i32_4, %c0_i32_8] : memref<8x128xf32, #tpu.memory_space<vmem>> -> memref<1x128xf32, #tpu.memory_space<vmem>>
    %17 = tpu.memref_slice %arg14[%c0_i32_6] : memref<2x!tpu.dma_semaphore, #tpu.memory_space<semaphore_mem>> -> memref<1x!tpu.dma_semaphore, #tpu.memory_space<semaphore_mem>>
    %18 = tpu.memref_squeeze %17 : memref<1x!tpu.dma_semaphore, #tpu.memory_space<semaphore_mem>> -> memref<!tpu.dma_semaphore, #tpu.memory_space<semaphore_mem>>
    tpu.enqueue_dma source(%15 : memref<1x128xf32, #tpu.memory_space<any>>) target(%16 : memref<1x128xf32, #tpu.memory_space<vmem>>) target_semaphore(%18 : memref<!tpu.dma_semaphore, #tpu.memory_space<semaphore_mem>>)
    %c2_i32 = arith.constant 2 : i32
    %c0_i32_9 = arith.constant 0 : i32
    %19 = arith.addi %2, %c0_i32_9 : i32
    %20 = arith.addi %19, %c2_i32 : i32
    %21 = arith.index_cast %20 : i32 to index
    %22 = memref.load %arg2[%21] : memref<32xi32, #tpu.memory_space<smem>>
    %c0_i32_10 = arith.constant 0 : i32
    %c0_i32_11 = arith.constant 0 : i32
    %23 = tpu.memref_slice %arg5[%22, %c0_i32_11] : memref<128x128xf32, #tpu.memory_space<any>> -> memref<1x128xf32, #tpu.memory_space<any>>
    %c0_i32_12 = arith.constant 0 : i32
    %24 = tpu.memref_slice %arg11[%c2_i32, %c0_i32_12] : memref<8x128xf32, #tpu.memory_space<vmem>> -> memref<1x128xf32, #tpu.memory_space<vmem>>
    %25 = tpu.memref_slice %arg14[%c0_i32_10] : memref<2x!tpu.dma_semaphore, #tpu.memory_space<semaphore_mem>> -> memref<1x!tpu.dma_semaphore, #tpu.memory_space<semaphore_mem>>
    %26 = tpu.memref_squeeze %25 : memref<1x!tpu.dma_semaphore, #tpu.memory_space<semaphore_mem>> -> memref<!tpu.dma_semaphore, #tpu.memory_space<semaphore_mem>>
    tpu.enqueue_dma source(%23 : memref<1x128xf32, #tpu.memory_space<any>>) target(%24 : memref<1x128xf32, #tpu.memory_space<vmem>>) target_semaphore(%26 : memref<!tpu.dma_semaphore, #tpu.memory_space<semaphore_mem>>)
    %c3_i32 = arith.constant 3 : i32
    %c0_i32_13 = arith.constant 0 : i32
    %27 = arith.addi %2, %c0_i32_13 : i32
    %28 = arith.addi %27, %c3_i32 : i32
    %29 = arith.index_cast %28 : i32 to index
    %30 = memref.load %arg2[%29] : memref<32xi32, #tpu.memory_space<smem>>
    %c0_i32_14 = arith.constant 0 : i32
    %c0_i32_15 = arith.constant 0 : i32
    %31 = tpu.memref_slice %arg5[%30, %c0_i32_15] : memref<128x128xf32, #tpu.memory_space<any>> -> memref<1x128xf32, #tpu.memory_space<any>>
    %c0_i32_16 = arith.constant 0 : i32
    %32 = tpu.memref_slice %arg11[%c3_i32, %c0_i32_16] : memref<8x128xf32, #tpu.memory_space<vmem>> -> memref<1x128xf32, #tpu.memory_space<vmem>>
    %33 = tpu.memref_slice %arg14[%c0_i32_14] : memref<2x!tpu.dma_semaphore, #tpu.memory_space<semaphore_mem>> -> memref<1x!tpu.dma_semaphore, #tpu.memory_space<semaphore_mem>>
    %34 = tpu.memref_squeeze %33 : memref<1x!tpu.dma_semaphore, #tpu.memory_space<semaphore_mem>> -> memref<!tpu.dma_semaphore, #tpu.memory_space<semaphore_mem>>
    tpu.enqueue_dma source(%31 : memref<1x128xf32, #tpu.memory_space<any>>) target(%32 : memref<1x128xf32, #tpu.memory_space<vmem>>) target_semaphore(%34 : memref<!tpu.dma_semaphore, #tpu.memory_space<semaphore_mem>>)
    %c4_i32 = arith.constant 4 : i32
    %c0_i32_17 = arith.constant 0 : i32
    %35 = arith.addi %2, %c0_i32_17 : i32
    %36 = arith.addi %35, %c4_i32 : i32
    %37 = arith.index_cast %36 : i32 to index
    %38 = memref.load %arg2[%37] : memref<32xi32, #tpu.memory_space<smem>>
    %c0_i32_18 = arith.constant 0 : i32
    %c0_i32_19 = arith.constant 0 : i32
    %39 = tpu.memref_slice %arg5[%38, %c0_i32_19] : memref<128x128xf32, #tpu.memory_space<any>> -> memref<1x128xf32, #tpu.memory_space<any>>
    %c0_i32_20 = arith.constant 0 : i32
    %40 = tpu.memref_slice %arg11[%c4_i32, %c0_i32_20] : memref<8x128xf32, #tpu.memory_space<vmem>> -> memref<1x128xf32, #tpu.memory_space<vmem>>
    %41 = tpu.memref_slice %arg14[%c0_i32_18] : memref<2x!tpu.dma_semaphore, #tpu.memory_space<semaphore_mem>> -> memref<1x!tpu.dma_semaphore, #tpu.memory_space<semaphore_mem>>
    %42 = tpu.memref_squeeze %41 : memref<1x!tpu.dma_semaphore, #tpu.memory_space<semaphore_mem>> -> memref<!tpu.dma_semaphore, #tpu.memory_space<semaphore_mem>>
    tpu.enqueue_dma source(%39 : memref<1x128xf32, #tpu.memory_space<any>>) target(%40 : memref<1x128xf32, #tpu.memory_space<vmem>>) target_semaphore(%42 : memref<!tpu.dma_semaphore, #tpu.memory_space<semaphore_mem>>)
    %c5_i32 = arith.constant 5 : i32
    %c0_i32_21 = arith.constant 0 : i32
    %43 = arith.addi %2, %c0_i32_21 : i32
    %44 = arith.addi %43, %c5_i32 : i32
    %45 = arith.index_cast %44 : i32 to index
    %46 = memref.load %arg2[%45] : memref<32xi32, #tpu.memory_space<smem>>
    %c0_i32_22 = arith.constant 0 : i32
    %c0_i32_23 = arith.constant 0 : i32
    %47 = tpu.memref_slice %arg5[%46, %c0_i32_23] : memref<128x128xf32, #tpu.memory_space<any>> -> memref<1x128xf32, #tpu.memory_space<any>>
    %c0_i32_24 = arith.constant 0 : i32
    %48 = tpu.memref_slice %arg11[%c5_i32, %c0_i32_24] : memref<8x128xf32, #tpu.memory_space<vmem>> -> memref<1x128xf32, #tpu.memory_space<vmem>>
    %49 = tpu.memref_slice %arg14[%c0_i32_22] : memref<2x!tpu.dma_semaphore, #tpu.memory_space<semaphore_mem>> -> memref<1x!tpu.dma_semaphore, #tpu.memory_space<semaphore_mem>>
    %50 = tpu.memref_squeeze %49 : memref<1x!tpu.dma_semaphore, #tpu.memory_space<semaphore_mem>> -> memref<!tpu.dma_semaphore, #tpu.memory_space<semaphore_mem>>
    tpu.enqueue_dma source(%47 : memref<1x128xf32, #tpu.memory_space<any>>) target(%48 : memref<1x128xf32, #tpu.memory_space<vmem>>) target_semaphore(%50 : memref<!tpu.dma_semaphore, #tpu.memory_space<semaphore_mem>>)
    %c6_i32 = arith.constant 6 : i32
    %c0_i32_25 = arith.constant 0 : i32
    %51 = arith.addi %2, %c0_i32_25 : i32
    %52 = arith.addi %51, %c6_i32 : i32
    %53 = arith.index_cast %52 : i32 to index
    %54 = memref.load %arg2[%53] : memref<32xi32, #tpu.memory_space<smem>>
    %c0_i32_26 = arith.constant 0 : i32
    %c0_i32_27 = arith.constant 0 : i32
    %55 = tpu.memref_slice %arg5[%54, %c0_i32_27] : memref<128x128xf32, #tpu.memory_space<any>> -> memref<1x128xf32, #tpu.memory_space<any>>
    %c0_i32_28 = arith.constant 0 : i32
    %56 = tpu.memref_slice %arg11[%c6_i32, %c0_i32_28] : memref<8x128xf32, #tpu.memory_space<vmem>> -> memref<1x128xf32, #tpu.memory_space<vmem>>
    %57 = tpu.memref_slice %arg14[%c0_i32_26] : memref<2x!tpu.dma_semaphore, #tpu.memory_space<semaphore_mem>> -> memref<1x!tpu.dma_semaphore, #tpu.memory_space<semaphore_mem>>
    %58 = tpu.memref_squeeze %57 : memref<1x!tpu.dma_semaphore, #tpu.memory_space<semaphore_mem>> -> memref<!tpu.dma_semaphore, #tpu.memory_space<semaphore_mem>>
    tpu.enqueue_dma source(%55 : memref<1x128xf32, #tpu.memory_space<any>>) target(%56 : memref<1x128xf32, #tpu.memory_space<vmem>>) target_semaphore(%58 : memref<!tpu.dma_semaphore, #tpu.memory_space<semaphore_mem>>)
    %c7_i32 = arith.constant 7 : i32
    %c0_i32_29 = arith.constant 0 : i32
    %59 = arith.addi %2, %c0_i32_29 : i32
    %60 = arith.addi %59, %c7_i32 : i32
    %61 = arith.index_cast %60 : i32 to index
    %62 = memref.load %arg2[%61] : memref<32xi32, #tpu.memory_space<smem>>
    %c0_i32_30 = arith.constant 0 : i32
    %c0_i32_31 = arith.constant 0 : i32
    %63 = tpu.memref_slice %arg5[%62, %c0_i32_31] : memref<128x128xf32, #tpu.memory_space<any>> -> memref<1x128xf32, #tpu.memory_space<any>>
    %c0_i32_32 = arith.constant 0 : i32
    %64 = tpu.memref_slice %arg11[%c7_i32, %c0_i32_32] : memref<8x128xf32, #tpu.memory_space<vmem>> -> memref<1x128xf32, #tpu.memory_space<vmem>>
    %65 = tpu.memref_slice %arg14[%c0_i32_30] : memref<2x!tpu.dma_semaphore, #tpu.memory_space<semaphore_mem>> -> memref<1x!tpu.dma_semaphore, #tpu.memory_space<semaphore_mem>>
    %66 = tpu.memref_squeeze %65 : memref<1x!tpu.dma_semaphore, #tpu.memory_space<semaphore_mem>> -> memref<!tpu.dma_semaphore, #tpu.memory_space<semaphore_mem>>
    tpu.enqueue_dma source(%63 : memref<1x128xf32, #tpu.memory_space<any>>) target(%64 : memref<1x128xf32, #tpu.memory_space<vmem>>) target_semaphore(%66 : memref<!tpu.dma_semaphore, #tpu.memory_space<semaphore_mem>>)
    %c8_i32 = arith.constant 8 : i32
    %c0_i32_33 = arith.constant 0 : i32
    %c8_i32_34 = arith.constant 8 : i32
    %67 = arith.addi %2, %c8_i32_34 : i32
    %68 = arith.addi %67, %c0_i32_33 : i32
    %69 = arith.index_cast %68 : i32 to index
    %70 = memref.load %arg2[%69] : memref<32xi32, #tpu.memory_space<smem>>
    %c1_i32_35 = arith.constant 1 : i32
    %c0_i32_36 = arith.constant 0 : i32
    %71 = tpu.memref_slice %arg5[%70, %c0_i32_36] : memref<128x128xf32, #tpu.memory_space<any>> -> memref<1x128xf32, #tpu.memory_space<any>>
    %c0_i32_37 = arith.constant 0 : i32
    %72 = tpu.memref_slice %arg12[%c0_i32_33, %c0_i32_37] : memref<8x128xf32, #tpu.memory_space<vmem>> -> memref<1x128xf32, #tpu.memory_space<vmem>>
    %73 = tpu.memref_slice %arg14[%c1_i32_35] : memref<2x!tpu.dma_semaphore, #tpu.memory_space<semaphore_mem>> -> memref<1x!tpu.dma_semaphore, #tpu.memory_space<semaphore_mem>>
    %74 = tpu.memref_squeeze %73 : memref<1x!tpu.dma_semaphore, #tpu.memory_space<semaphore_mem>> -> memref<!tpu.dma_semaphore, #tpu.memory_space<semaphore_mem>>
    tpu.enqueue_dma source(%71 : memref<1x128xf32, #tpu.memory_space<any>>) target(%72 : memref<1x128xf32, #tpu.memory_space<vmem>>) target_semaphore(%74 : memref<!tpu.dma_semaphore, #tpu.memory_space<semaphore_mem>>)
    %c1_i32_38 = arith.constant 1 : i32
    %c8_i32_39 = arith.constant 8 : i32
    %75 = arith.addi %2, %c8_i32_39 : i32
    %76 = arith.addi %75, %c1_i32_38 : i32
    %77 = arith.index_cast %76 : i32 to index
    %78 = memref.load %arg2[%77] : memref<32xi32, #tpu.memory_space<smem>>
    %c1_i32_40 = arith.constant 1 : i32
    %c0_i32_41 = arith.constant 0 : i32
    %79 = tpu.memref_slice %arg5[%78, %c0_i32_41] : memref<128x128xf32, #tpu.memory_space<any>> -> memref<1x128xf32, #tpu.memory_space<any>>
    %c0_i32_42 = arith.constant 0 : i32
    %80 = tpu.memref_slice %arg12[%c1_i32_38, %c0_i32_42] : memref<8x128xf32, #tpu.memory_space<vmem>> -> memref<1x128xf32, #tpu.memory_space<vmem>>
    %81 = tpu.memref_slice %arg14[%c1_i32_40] : memref<2x!tpu.dma_semaphore, #tpu.memory_space<semaphore_mem>> -> memref<1x!tpu.dma_semaphore, #tpu.memory_space<semaphore_mem>>
    %82 = tpu.memref_squeeze %81 : memref<1x!tpu.dma_semaphore, #tpu.memory_space<semaphore_mem>> -> memref<!tpu.dma_semaphore, #tpu.memory_space<semaphore_mem>>
    tpu.enqueue_dma source(%79 : memref<1x128xf32, #tpu.memory_space<any>>) target(%80 : memref<1x128xf32, #tpu.memory_space<vmem>>) target_semaphore(%82 : memref<!tpu.dma_semaphore, #tpu.memory_space<semaphore_mem>>)
    %c2_i32_43 = arith.constant 2 : i32
    %c8_i32_44 = arith.constant 8 : i32
    %83 = arith.addi %2, %c8_i32_44 : i32
    %84 = arith.addi %83, %c2_i32_43 : i32
    %85 = arith.index_cast %84 : i32 to index
    %86 = memref.load %arg2[%85] : memref<32xi32, #tpu.memory_space<smem>>
    %c1_i32_45 = arith.constant 1 : i32
    %c0_i32_46 = arith.constant 0 : i32
    %87 = tpu.memref_slice %arg5[%86, %c0_i32_46] : memref<128x128xf32, #tpu.memory_space<any>> -> memref<1x128xf32, #tpu.memory_space<any>>
    %c0_i32_47 = arith.constant 0 : i32
    %88 = tpu.memref_slice %arg12[%c2_i32_43, %c0_i32_47] : memref<8x128xf32, #tpu.memory_space<vmem>> -> memref<1x128xf32, #tpu.memory_space<vmem>>
    %89 = tpu.memref_slice %arg14[%c1_i32_45] : memref<2x!tpu.dma_semaphore, #tpu.memory_space<semaphore_mem>> -> memref<1x!tpu.dma_semaphore, #tpu.memory_space<semaphore_mem>>
    %90 = tpu.memref_squeeze %89 : memref<1x!tpu.dma_semaphore, #tpu.memory_space<semaphore_mem>> -> memref<!tpu.dma_semaphore, #tpu.memory_space<semaphore_mem>>
    tpu.enqueue_dma source(%87 : memref<1x128xf32, #tpu.memory_space<any>>) target(%88 : memref<1x128xf32, #tpu.memory_space<vmem>>) target_semaphore(%90 : memref<!tpu.dma_semaphore, #tpu.memory_space<semaphore_mem>>)
    %c3_i32_48 = arith.constant 3 : i32
    %c8_i32_49 = arith.constant 8 : i32
    %91 = arith.addi %2, %c8_i32_49 : i32
    %92 = arith.addi %91, %c3_i32_48 : i32
    %93 = arith.index_cast %92 : i32 to index
    %94 = memref.load %arg2[%93] : memref<32xi32, #tpu.memory_space<smem>>
    %c1_i32_50 = arith.constant 1 : i32
    %c0_i32_51 = arith.constant 0 : i32
    %95 = tpu.memref_slice %arg5[%94, %c0_i32_51] : memref<128x128xf32, #tpu.memory_space<any>> -> memref<1x128xf32, #tpu.memory_space<any>>
    %c0_i32_52 = arith.constant 0 : i32
    %96 = tpu.memref_slice %arg12[%c3_i32_48, %c0_i32_52] : memref<8x128xf32, #tpu.memory_space<vmem>> -> memref<1x128xf32, #tpu.memory_space<vmem>>
    %97 = tpu.memref_slice %arg14[%c1_i32_50] : memref<2x!tpu.dma_semaphore, #tpu.memory_space<semaphore_mem>> -> memref<1x!tpu.dma_semaphore, #tpu.memory_space<semaphore_mem>>
    %98 = tpu.memref_squeeze %97 : memref<1x!tpu.dma_semaphore, #tpu.memory_space<semaphore_mem>> -> memref<!tpu.dma_semaphore, #tpu.memory_space<semaphore_mem>>
    tpu.enqueue_dma source(%95 : memref<1x128xf32, #tpu.memory_space<any>>) target(%96 : memref<1x128xf32, #tpu.memory_space<vmem>>) target_semaphore(%98 : memref<!tpu.dma_semaphore, #tpu.memory_space<semaphore_mem>>)
    %c4_i32_53 = arith.constant 4 : i32
    %c8_i32_54 = arith.constant 8 : i32
    %99 = arith.addi %2, %c8_i32_54 : i32
    %100 = arith.addi %99, %c4_i32_53 : i32
    %101 = arith.index_cast %100 : i32 to index
    %102 = memref.load %arg2[%101] : memref<32xi32, #tpu.memory_space<smem>>
    %c1_i32_55 = arith.constant 1 : i32
    %c0_i32_56 = arith.constant 0 : i32
    %103 = tpu.memref_slice %arg5[%102, %c0_i32_56] : memref<128x128xf32, #tpu.memory_space<any>> -> memref<1x128xf32, #tpu.memory_space<any>>
    %c0_i32_57 = arith.constant 0 : i32
    %104 = tpu.memref_slice %arg12[%c4_i32_53, %c0_i32_57] : memref<8x128xf32, #tpu.memory_space<vmem>> -> memref<1x128xf32, #tpu.memory_space<vmem>>
    %105 = tpu.memref_slice %arg14[%c1_i32_55] : memref<2x!tpu.dma_semaphore, #tpu.memory_space<semaphore_mem>> -> memref<1x!tpu.dma_semaphore, #tpu.memory_space<semaphore_mem>>
    %106 = tpu.memref_squeeze %105 : memref<1x!tpu.dma_semaphore, #tpu.memory_space<semaphore_mem>> -> memref<!tpu.dma_semaphore, #tpu.memory_space<semaphore_mem>>
    tpu.enqueue_dma source(%103 : memref<1x128xf32, #tpu.memory_space<any>>) target(%104 : memref<1x128xf32, #tpu.memory_space<vmem>>) target_semaphore(%106 : memref<!tpu.dma_semaphore, #tpu.memory_space<semaphore_mem>>)
    %c5_i32_58 = arith.constant 5 : i32
    %c8_i32_59 = arith.constant 8 : i32
    %107 = arith.addi %2, %c8_i32_59 : i32
    %108 = arith.addi %107, %c5_i32_58 : i32
    %109 = arith.index_cast %108 : i32 to index
    %110 = memref.load %arg2[%109] : memref<32xi32, #tpu.memory_space<smem>>
    %c1_i32_60 = arith.constant 1 : i32
    %c0_i32_61 = arith.constant 0 : i32
    %111 = tpu.memref_slice %arg5[%110, %c0_i32_61] : memref<128x128xf32, #tpu.memory_space<any>> -> memref<1x128xf32, #tpu.memory_space<any>>
    %c0_i32_62 = arith.constant 0 : i32
    %112 = tpu.memref_slice %arg12[%c5_i32_58, %c0_i32_62] : memref<8x128xf32, #tpu.memory_space<vmem>> -> memref<1x128xf32, #tpu.memory_space<vmem>>
    %113 = tpu.memref_slice %arg14[%c1_i32_60] : memref<2x!tpu.dma_semaphore, #tpu.memory_space<semaphore_mem>> -> memref<1x!tpu.dma_semaphore, #tpu.memory_space<semaphore_mem>>
    %114 = tpu.memref_squeeze %113 : memref<1x!tpu.dma_semaphore, #tpu.memory_space<semaphore_mem>> -> memref<!tpu.dma_semaphore, #tpu.memory_space<semaphore_mem>>
    tpu.enqueue_dma source(%111 : memref<1x128xf32, #tpu.memory_space<any>>) target(%112 : memref<1x128xf32, #tpu.memory_space<vmem>>) target_semaphore(%114 : memref<!tpu.dma_semaphore, #tpu.memory_space<semaphore_mem>>)
    %c6_i32_63 = arith.constant 6 : i32
    %c8_i32_64 = arith.constant 8 : i32
    %115 = arith.addi %2, %c8_i32_64 : i32
    %116 = arith.addi %115, %c6_i32_63 : i32
    %117 = arith.index_cast %116 : i32 to index
    %118 = memref.load %arg2[%117] : memref<32xi32, #tpu.memory_space<smem>>
    %c1_i32_65 = arith.constant 1 : i32
    %c0_i32_66 = arith.constant 0 : i32
    %119 = tpu.memref_slice %arg5[%118, %c0_i32_66] : memref<128x128xf32, #tpu.memory_space<any>> -> memref<1x128xf32, #tpu.memory_space<any>>
    %c0_i32_67 = arith.constant 0 : i32
    %120 = tpu.memref_slice %arg12[%c6_i32_63, %c0_i32_67] : memref<8x128xf32, #tpu.memory_space<vmem>> -> memref<1x128xf32, #tpu.memory_space<vmem>>
    %121 = tpu.memref_slice %arg14[%c1_i32_65] : memref<2x!tpu.dma_semaphore, #tpu.memory_space<semaphore_mem>> -> memref<1x!tpu.dma_semaphore, #tpu.memory_space<semaphore_mem>>
    %122 = tpu.memref_squeeze %121 : memref<1x!tpu.dma_semaphore, #tpu.memory_space<semaphore_mem>> -> memref<!tpu.dma_semaphore, #tpu.memory_space<semaphore_mem>>
    tpu.enqueue_dma source(%119 : memref<1x128xf32, #tpu.memory_space<any>>) target(%120 : memref<1x128xf32, #tpu.memory_space<vmem>>) target_semaphore(%122 : memref<!tpu.dma_semaphore, #tpu.memory_space<semaphore_mem>>)
    %c7_i32_68 = arith.constant 7 : i32
    %c8_i32_69 = arith.constant 8 : i32
    %123 = arith.addi %2, %c8_i32_69 : i32
    %124 = arith.addi %123, %c7_i32_68 : i32
    %125 = arith.index_cast %124 : i32 to index
    %126 = memref.load %arg2[%125] : memref<32xi32, #tpu.memory_space<smem>>
    %c1_i32_70 = arith.constant 1 : i32
    %c0_i32_71 = arith.constant 0 : i32
    %127 = tpu.memref_slice %arg5[%126, %c0_i32_71] : memref<128x128xf32, #tpu.memory_space<any>> -> memref<1x128xf32, #tpu.memory_space<any>>
    %c0_i32_72 = arith.constant 0 : i32
    %128 = tpu.memref_slice %arg12[%c7_i32_68, %c0_i32_72] : memref<8x128xf32, #tpu.memory_space<vmem>> -> memref<1x128xf32, #tpu.memory_space<vmem>>
    %129 = tpu.memref_slice %arg14[%c1_i32_70] : memref<2x!tpu.dma_semaphore, #tpu.memory_space<semaphore_mem>> -> memref<1x!tpu.dma_semaphore, #tpu.memory_space<semaphore_mem>>
    %130 = tpu.memref_squeeze %129 : memref<1x!tpu.dma_semaphore, #tpu.memory_space<semaphore_mem>> -> memref<!tpu.dma_semaphore, #tpu.memory_space<semaphore_mem>>
    tpu.enqueue_dma source(%127 : memref<1x128xf32, #tpu.memory_space<any>>) target(%128 : memref<1x128xf32, #tpu.memory_space<vmem>>) target_semaphore(%130 : memref<!tpu.dma_semaphore, #tpu.memory_space<semaphore_mem>>)
    %c8_i32_73 = arith.constant 8 : i32
    %c0 = arith.constant 0 : index
    %c0_74 = arith.constant 0 : index
    %c0_75 = arith.constant 0 : index
    %131 = vector.load %arg4[%c0, %c0_74, %c0_75] : memref<1x16x1xi32, #tpu.memory_space<vmem>>, vector<1x16x1xi32>
    %132 = vector.shape_cast %131 : vector<1x16x1xi32> to vector<16x1xi32>
    %c0_i32_76 = arith.constant 0 : i32
    %133 = vector.broadcast %c0_i32_76 : i32 to vector<16x1xi32>
    %134 = arith.cmpi eq, %132, %133 : vector<16x1xi32>
    %c0_77 = arith.constant 0 : index
    %c0_78 = arith.constant 0 : index
    %135 = vector.load %arg7[%c0_77, %c0_78] : memref<2x128xf32, #tpu.memory_space<vmem>>, vector<1x128xf32>
    %c1 = arith.constant 1 : index
    %c0_79 = arith.constant 0 : index
    %136 = vector.load %arg7[%c1, %c0_79] : memref<2x128xf32, #tpu.memory_space<vmem>>, vector<1x128xf32>
    %137 = vector.shape_cast %134 : vector<16x1xi1> to vector<16x1xi1>
    %138 = vector.broadcast %137 : vector<16x1xi1> to vector<16x128xi1>
    %139 = vector.shape_cast %135 : vector<1x128xf32> to vector<1x128xf32>
    %140 = vector.broadcast %139 : vector<1x128xf32> to vector<16x128xf32>
    %141 = vector.shape_cast %136 : vector<1x128xf32> to vector<1x128xf32>
    %142 = vector.broadcast %141 : vector<1x128xf32> to vector<16x128xf32>
    %143 = arith.select %138, %140, %142 : vector<16x128xi1>, vector<16x128xf32>
    %144 = arith.index_cast %2 : i32 to index
    %145 = memref.load %arg3[%144] : memref<32xi32, #tpu.memory_space<smem>>
    %146 = tpu.assume_multiple %145, 8 : i32
    %147 = arith.index_cast %146 : i32 to index
    %c0_80 = arith.constant 0 : index
    %148 = vector.load %arg6[%147, %c0_80] : memref<64x128xf32, #tpu.memory_space<vmem>>, vector<16x128xf32>
    %149 = arith.addf %148, %143 : vector<16x128xf32>
    %c0_81 = arith.constant 0 : index
    %c0_82 = arith.constant 0 : index
    %150 = vector.load %arg13[%c0_81, %c0_82] : memref<16x128xf32, #tpu.memory_space<vmem>>, vector<16x128xf32>
    tpu.vector_store %arg13[%c0_81, %c0_82], %149 {strides = array<i32>} : memref<16x128xf32, #tpu.memory_space<vmem>>, vector<16x128xf32>,
    %c0_83 = arith.constant 0 : index
    %c0_84 = arith.constant 0 : index
    %151 = vector.load %arg8[%c0_83, %c0_84] : memref<1x128xf32, #tpu.memory_space<vmem>>, vector<1x128xf32>
    %c0_85 = arith.constant 0 : index
    %c0_86 = arith.constant 0 : index
    %152 = vector.load %arg9[%c0_85, %c0_86] : memref<1x128xf32, #tpu.memory_space<vmem>>, vector<1x128xf32>
    %c0_i32_87 = arith.constant 0 : i32
    %c0_i32_88 = arith.constant 0 : i32
    %c0_i32_89 = arith.constant 0 : i32
    %153 = tpu.memref_slice %arg5[%c0_i32_88, %c0_i32_89] : memref<128x128xf32, #tpu.memory_space<any>> -> memref<8x128xf32, #tpu.memory_space<any>>
    %154 = tpu.memref_slice %arg14[%c0_i32_87] : memref<2x!tpu.dma_semaphore, #tpu.memory_space<semaphore_mem>> -> memref<1x!tpu.dma_semaphore, #tpu.memory_space<semaphore_mem>>
    %155 = tpu.memref_squeeze %154 : memref<1x!tpu.dma_semaphore, #tpu.memory_space<semaphore_mem>> -> memref<!tpu.dma_semaphore, #tpu.memory_space<semaphore_mem>>
    tpu.wait_dma2 semaphore(%155 : memref<!tpu.dma_semaphore, #tpu.memory_space<semaphore_mem>>) src(%153 : memref<8x128xf32, #tpu.memory_space<any>>) dst(%arg11 : memref<8x128xf32, #tpu.memory_space<vmem>>)
    %c0_90 = arith.constant 0 : index
    %c0_91 = arith.constant 0 : index
    %156 = vector.load %arg11[%c0_90, %c0_91] : memref<8x128xf32, #tpu.memory_space<vmem>>, vector<8x128xf32>
    %c0_92 = arith.constant 0 : index
    %c0_93 = arith.constant 0 : index
    %157 = vector.load %arg13[%c0_92, %c0_93] : memref<16x128xf32, #tpu.memory_space<vmem>>, vector<8x128xf32>
    %158 = arith.addf %156, %157 : vector<8x128xf32>
    %cst = arith.constant dense<0.000000e+00> : vector<8xf32>
    %159 = vector.multi_reduction <add>, %158, %cst [1] : vector<8x128xf32> to vector<8xf32>
    %160 = vector.shape_cast %159 : vector<8xf32> to vector<8x1xf32>
    %cst_94 = arith.constant 7.812500e-03 : f32
    %161 = vector.broadcast %cst_94 : f32 to vector<8x1xf32>
    %162 = arith.mulf %160, %161 : vector<8x1xf32>
    %163 = vector.broadcast %162 : vector<8x1xf32> to vector<8x128xf32>
    %164 = arith.subf %158, %163 : vector<8x128xf32>
    %165 = arith.mulf %164, %164 : vector<8x128xf32>
    %cst_95 = arith.constant dense<0.000000e+00> : vector<8xf32>
    %166 = vector.multi_reduction <add>, %165, %cst_95 [1] : vector<8x128xf32> to vector<8xf32>
    %167 = vector.shape_cast %166 : vector<8xf32> to vector<8x1xf32>
    %cst_96 = arith.constant 7.812500e-03 : f32
    %168 = vector.broadcast %cst_96 : f32 to vector<8x1xf32>
    %169 = arith.mulf %167, %168 : vector<8x1xf32>
    %cst_97 = arith.constant 9.99999996E-13 : f32
    %170 = vector.broadcast %cst_97 : f32 to vector<8x1xf32>
    %171 = arith.addf %169, %170 : vector<8x1xf32>
    %172 = math.rsqrt %171 : vector<8x1xf32>
    %173 = vector.broadcast %172 : vector<8x1xf32> to vector<8x128xf32>
    %174 = arith.mulf %164, %173 : vector<8x128xf32>
    %175 = vector.broadcast %151 : vector<1x128xf32> to vector<8x128xf32>
    %176 = arith.mulf %174, %175 : vector<8x128xf32>
    %177 = vector.broadcast %152 : vector<1x128xf32> to vector<8x128xf32>
    %178 = arith.addf %176, %177 : vector<8x128xf32>
    %c0_98 = arith.constant 0 : index
    %c0_99 = arith.constant 0 : index
    %c0_100 = arith.constant 0 : index
    %179 = vector.load %arg10[%c0_98, %c0_99, %c0_100] : memref<1x16x128xf32, #tpu.memory_space<vmem>>, vector<1x8x128xf32>
    %180 = vector.shape_cast %179 : vector<1x8x128xf32> to vector<8x128xf32>
    %181 = vector.shape_cast %178 : vector<8x128xf32> to vector<1x8x128xf32>
    tpu.vector_store %arg10[%c0_98, %c0_99, %c0_100], %181 {strides = array<i32>} : memref<1x16x128xf32, #tpu.memory_space<vmem>>, vector<1x8x128xf32>,
    %c1_i32_101 = arith.constant 1 : i32
    %c0_i32_102 = arith.constant 0 : i32
    %c0_i32_103 = arith.constant 0 : i32
    %182 = tpu.memref_slice %arg5[%c0_i32_102, %c0_i32_103] : memref<128x128xf32, #tpu.memory_space<any>> -> memref<8x128xf32, #tpu.memory_space<any>>
    %183 = tpu.memref_slice %arg14[%c1_i32_101] : memref<2x!tpu.dma_semaphore, #tpu.memory_space<semaphore_mem>> -> memref<1x!tpu.dma_semaphore, #tpu.memory_space<semaphore_mem>>
    %184 = tpu.memref_squeeze %183 : memref<1x!tpu.dma_semaphore, #tpu.memory_space<semaphore_mem>> -> memref<!tpu.dma_semaphore, #tpu.memory_space<semaphore_mem>>
    tpu.wait_dma2 semaphore(%184 : memref<!tpu.dma_semaphore, #tpu.memory_space<semaphore_mem>>) src(%182 : memref<8x128xf32, #tpu.memory_space<any>>) dst(%arg12 : memref<8x128xf32, #tpu.memory_space<vmem>>)
    %c0_104 = arith.constant 0 : index
    %c0_105 = arith.constant 0 : index
    %185 = vector.load %arg12[%c0_104, %c0_105] : memref<8x128xf32, #tpu.memory_space<vmem>>, vector<8x128xf32>
    %c8 = arith.constant 8 : index
    %c0_106 = arith.constant 0 : index
    %186 = vector.load %arg13[%c8, %c0_106] : memref<16x128xf32, #tpu.memory_space<vmem>>, vector<8x128xf32>
    %187 = arith.addf %185, %186 : vector<8x128xf32>
    %cst_107 = arith.constant dense<0.000000e+00> : vector<8xf32>
    %188 = vector.multi_reduction <add>, %187, %cst_107 [1] : vector<8x128xf32> to vector<8xf32>
    %189 = vector.shape_cast %188 : vector<8xf32> to vector<8x1xf32>
    %cst_108 = arith.constant 7.812500e-03 : f32
    %190 = vector.broadcast %cst_108 : f32 to vector<8x1xf32>
    %191 = arith.mulf %189, %190 : vector<8x1xf32>
    %192 = vector.broadcast %191 : vector<8x1xf32> to vector<8x128xf32>
    %193 = arith.subf %187, %192 : vector<8x128xf32>
    %194 = arith.mulf %193, %193 : vector<8x128xf32>
    %cst_109 = arith.constant dense<0.000000e+00> : vector<8xf32>
    %195 = vector.multi_reduction <add>, %194, %cst_109 [1] : vector<8x128xf32> to vector<8xf32>
    %196 = vector.shape_cast %195 : vector<8xf32> to vector<8x1xf32>
    %cst_110 = arith.constant 7.812500e-03 : f32
    %197 = vector.broadcast %cst_110 : f32 to vector<8x1xf32>
    %198 = arith.mulf %196, %197 : vector<8x1xf32>
    %cst_111 = arith.constant 9.99999996E-13 : f32
    %199 = vector.broadcast %cst_111 : f32 to vector<8x1xf32>
    %200 = arith.addf %198, %199 : vector<8x1xf32>
    %201 = math.rsqrt %200 : vector<8x1xf32>
    %202 = vector.broadcast %201 : vector<8x1xf32> to vector<8x128xf32>
    %203 = arith.mulf %193, %202 : vector<8x128xf32>
    %204 = vector.broadcast %151 : vector<1x128xf32> to vector<8x128xf32>
    %205 = arith.mulf %203, %204 : vector<8x128xf32>
    %206 = vector.broadcast %152 : vector<1x128xf32> to vector<8x128xf32>
    %207 = arith.addf %205, %206 : vector<8x128xf32>
    %c0_112 = arith.constant 0 : index
    %c8_113 = arith.constant 8 : index
    %c0_114 = arith.constant 0 : index
    %208 = vector.load %arg10[%c0_112, %c8_113, %c0_114] : memref<1x16x128xf32, #tpu.memory_space<vmem>>, vector<1x8x128xf32>
    %209 = vector.shape_cast %208 : vector<1x8x128xf32> to vector<8x128xf32>
    %210 = vector.shape_cast %207 : vector<8x128xf32> to vector<1x8x128xf32>
    tpu.vector_store %arg10[%c0_112, %c8_113, %c0_114], %210 {strides = array<i32>} : memref<1x16x128xf32, #tpu.memory_space<vmem>>, vector<1x8x128xf32>,
    return
  }
  func.func @transform_0(%arg0: i32, %arg1: i32, %arg2: memref<32xi32, #tpu.memory_space<smem>>, %arg3: memref<32xi32, #tpu.memory_space<smem>>) -> (i32, i32, i32) {
    %c0_i32 = arith.constant 0 : i32
    %c0_i32_0 = arith.constant 0 : i32
    return %arg0, %arg1, %c0_i32 : i32, i32, i32
  }
  func.func @transform_2(%arg0: i32, %arg1: i32, %arg2: memref<32xi32, #tpu.memory_space<smem>>, %arg3: memref<32xi32, #tpu.memory_space<smem>>) -> (i32, i32) {
    %c0_i32 = arith.constant 0 : i32
    %c0_i32_0 = arith.constant 0 : i32
    %c0_i32_1 = arith.constant 0 : i32
    return %c0_i32, %c0_i32_0 : i32, i32
  }
  func.func @transform_3(%arg0: i32, %arg1: i32, %arg2: memref<32xi32, #tpu.memory_space<smem>>, %arg3: memref<32xi32, #tpu.memory_space<smem>>) -> (i32, i32) {
    %c0_i32 = arith.constant 0 : i32
    %c0_i32_0 = arith.constant 0 : i32
    %c0_i32_1 = arith.constant 0 : i32
    return %c0_i32, %c0_i32_0 : i32, i32
  }
  func.func @transform_4(%arg0: i32, %arg1: i32, %arg2: memref<32xi32, #tpu.memory_space<smem>>, %arg3: memref<32xi32, #tpu.memory_space<smem>>) -> (i32, i32) {
    %c0_i32 = arith.constant 0 : i32
    %c0_i32_0 = arith.constant 0 : i32
    %c0_i32_1 = arith.constant 0 : i32
    return %c0_i32, %c0_i32_0 : i32, i32
  }
  func.func @transform_5(%arg0: i32, %arg1: i32, %arg2: memref<32xi32, #tpu.memory_space<smem>>, %arg3: memref<32xi32, #tpu.memory_space<smem>>) -> (i32, i32) {
    %c0_i32 = arith.constant 0 : i32
    %c0_i32_0 = arith.constant 0 : i32
    %c0_i32_1 = arith.constant 0 : i32
    return %c0_i32, %c0_i32_0 : i32, i32
  }
  func.func @transform_6(%arg0: i32, %arg1: i32, %arg2: memref<32xi32, #tpu.memory_space<smem>>, %arg3: memref<32xi32, #tpu.memory_space<smem>>) -> (i32, i32, i32) {
    %c0_i32 = arith.constant 0 : i32
    %c0_i32_0 = arith.constant 0 : i32
    return %arg0, %arg1, %c0_i32 : i32, i32, i32
  }
}

</mosaic_0001>

<bundles_post_ra>
// kernel: tpu_custom_call.1
= control target key start
LH: loop header
LB: loop body
LE: loop exit
PB: predicated region body
PF: predicated region fallthrough
CT: control target
= control target key end

     0   :  { %s1435_s11 = smov [#allocation7]   ;;  %s1436_s12 = smov [#allocation8]   ;;  %s1826_s0 = inlined_call_operand.vmem [shape: s32[32], index: 0, kind: input, shape index: {}]   ;;  %s1827_s2 = inlined_call_operand.vmem [shape: s32[2,16,1], index: 2, kind: input, shape index: {}]   ;;  %s1828_s3 = inlined_call_operand.hbm [shape: f32[128,128], index: 3, kind: input, shape index: {}]   ;;  %s1829_s4 = inlined_call_operand.hbm [shape: f32[64,128], index: 4, kind: input, shape index: {}]   ;;  %s1830_s5 = inlined_call_operand.vmem [shape: f32[2,128], index: 5, kind: input, shape index: {}]   ;;  %s1831_s6 = inlined_call_operand.vmem [shape: f32[1,128], index: 6, kind: input, shape index: {}]   ;;  %s1832_s7 = inlined_call_operand.vmem [shape: f32[1,128], index: 7, kind: input, shape index: {}]   ;;  %s1833_s8 = inlined_call_operand.hbm [shape: f32[2,16,128], index: 8, kind: output, shape index: {}]   ;;  %s1834_s1 = inlined_call_operand.vmem [shape: s32[32], index: 1, kind: input, shape index: {}]  }
   0x1   :  { %1838 = sst [smem:[#allocation54_spill]] %s1827_s2  ;;  %s14_s29 = sshll.u32 %s1826_s0, 4  ;;  %s15_s29 = int_to_ptr.vmem [resolvable:$true] %s14_s29 }
   0x2   :  { %1839 = sst [smem:[#allocation55_spill]] %s1829_s4  ;;  %s19_s10 = sshll.u32 %s1834_s1, 4  ;;  %s20_s10 = int_to_ptr.vmem [resolvable:$true] %s19_s10 }
   0x3   :  { %1840 = sst [smem:[#allocation56_spill]] %s1831_s6 }
   0x4   :  { %1841 = sst [smem:[#allocation57_spill]] %s1832_s7 }
   0x5   :  { %17 = dma.vmem_to_smem %s15_s29, 16, %s1435_s11, [#allocation6] }
   0x6   :  { %22 = dma.vmem_to_smem %s20_s10, 16, %s1436_s12, [#allocation6] }
   0x7   :  { %1397 = dma.done.wait [#allocation6], 32 }
   0x8   :  { %1398 = vsyncadd [#allocation6], 4294967264 }
   0x9   :  { %25 = sfence }
   0xa   :  { %26 = vsyncpa [#allocation10], 0 }
   0xb   :  { %27 = vsyncpa [#allocation11], 0 }
   0xc   :  { %29 = vsyncpa [#allocation11 + $0x1], 0  ;;  %s1510_s13 = smov 0   ;;  %s1512_s14 = smov 0  }
   0xd   :  { %s1514_s0 = smov 0   ;;  %s1516_s15 = smov 0  }
   0xe   :  { %s1518_s1 = smov 0   ;;  %s1520_s16 = smov 0  }
   0xf LB: > { %s791_s17 = sadd.s32 4294967295, %s1433_s16   ;;  %s792_s18 = sadd.s32 4294967294, %s1433_s16   ;;  %s1433_s16 = sphi %s1520_s16, %s35_s16   ;;  %s1429_s1 = sphi %s1518_s1, %s1858_s1   ;;  %s1425_s15 = sphi %s1516_s15, %s1857_s15   ;;  %s1421_s0 = sphi %s1514_s0, %s1856_s0   ;;  %s1417_s14 = sphi %s1512_s14, %s1855_s14   ;;  %s1413_s13 = sphi %s1510_s13, %s1854_s13  }
  0x10   : > { %s47_s19 = sadd.s32 1, %s1429_s1  ;;  %s168_s20 = sadd.s32 1, %s1421_s0 }
  0x11   : > { %p49_p0 = scmp.ge.s32.totalorder %s47_s19, 2  ;;  %p178_p1 = scmp.ne.s32.totalorder %s1421_s0, %s1417_s14 }
  0x12   : > { %p179_p2 = scmp.eq.s32.totalorder %s791_s17, 1  ;;  %p184_p3 = scmp.ne.s32.totalorder %s1417_s14, %s1413_s13 }
  0x13   : > { %s1860_s19 = smov (%p49_p0, %s47_s19), 0  ;;  %p185_p5 = scmp.eq.s32.totalorder %s792_s18, 1 }
  0x14   : > { %1842 = sst [smem:[#allocation52_spill]] %s1860_s19  ;;  %p1550_p4 = por %p179_p2, %p178_p1 }
  0x15   : > { %s163_s22 = ssub.s32 %s1429_s1, %s1860_s19  ;;  %p793_p6 = scmp.ge.s32.totalorder %s1433_s16, 1 }
  0x16   : > { %p166_p7 = scmp.eq.s32.totalorder %s163_s22, 0  ;;  %p1557_p8 = por %p185_p5, %p184_p3 }
  0x17   : > { %p192_p9 = scmp.lt.s32.totalorder %s1433_s16, 3  ;;  %p825_p11 = scmp.eq.s32.totalorder %s791_s17, 0 }
  0x18   : > { %s1563_s24 = scalar_select %p166_p7, %s1421_s0, %s168_s20  }
  0x19   : > { %p193_p10 = pnand %p793_p6, %p192_p9  ;;  %s1845_s4 = sld [smem:[#allocation55_spill]] }
  0x1a   : > { %s1437_s28 = smov [#allocation9]   ;;  %s1438_s30 = smov 128  }
  0x1b   : > { %p817_p12 = pneg %p193_p10  ;;  %s205_s29 = sshll.u32 %s1437_s28, 4  ;;  %s206_s29 = int_to_ptr.vmem [resolvable:$true] %s205_s29 }
  0x1c   : > { %s1439_s9 = smov 8   ;;  %243 = sbr.rel (%p193_p10) target bundleno = 803 (0x323), region = 40 }
  0x1d   : > { %p818_p13 = pnand %p825_p11, %p817_p12 }
  0x1f   : > { %s203_s27 = sshll.u32 %s1845_s4, 4  ;;  %s204_s27 = int_to_ptr.hbm [resolvable:$true] %s203_s27 }
  0x20   : > { %820 = dma.hbm_to_vmem [thread:$0]  (!%p818_p13), %s204_s27, 1024, %s206_s29, [#allocation10], %s1438_s30, %s1438_s30, %s1439_s9  }
  0x21   : > { %1400 = dma.done.wait (%p825_p11), [#allocation10], 1024  }
  0x22   : > { %1402 = vsyncadd (%p825_p11), [#allocation10], 4294966272  ;;  %p277_p0 = scmp.lt.s32.totalorder %s1425_s15, 1  ;;  %s1835_s10 = sand.u32 1, %s1417_s14   ;;  %v1440_v0 = vmov 0  }
  0x23   : > { %900 = vset.pattern.permute.xlu0 %v1440_v0  ;;  %s1572_s11 = sshll.u32 %s1835_s10, 4  ;;  %s1575_s12 = sshll.u32 %s1425_s15, 4 }
  0x24   : > { %s1862_s15 = smov (!%p277_p0, %s1425_s15), 1  ;;  %s289_s17 = sld [smem:[#allocation7 + %s1575_s12]] }
  0x25   : > { %s809_s18 = sshll.u32 %s1862_s15, 4  ;;  %s1846_s2 = sld [smem:[#allocation54_spill]] }
  0x26   : > { %s1441_s26 = smov [#allocation2]   ;;  %s304_s28 = sadd.s32 1, %s1575_s12 }
  0x27   : > { %s1582_s27 = sshll.u32 %s1441_s26, 4  ;;  %s1847_s6 = sld [smem:[#allocation56_spill]]  ;;  %s301_s27 = int_to_ptr.vmem [resolvable:$true] %s1582_s27 }
  0x28   : > { %s1848_s7 = sld [smem:[#allocation57_spill]]  ;;  %s1608_s20 = scalar_lea.hbm %s1828_s3, 128 }
  0x29   : > { %s305_s15 = sld [smem:[#allocation7 + %s304_s28]] }
  0x2a   : > { %s290_s26 = scalar_lea.hbm %s1828_s3, %s289_s17 }
  0x2b   : > { %s284_s25 = scalar_lea.vmem %s1846_s2, %s809_s18  ;;  %s321_s18 = sadd.s32 2, %s1575_s12 }
  0x2c   : > { %v559_v3 = vld [vmem:[%s284_s25] sm:$0xff]  ;;  %v560_v5 = vld [vmem:[%s284_s25 + $0x8] sm:$0xff]  ;;  %s1442_s2 = smov [#allocation2 + $0x1]   ;;  %s298_s30 = sshll.u32 %s290_s26, 4  ;;  %s299_s30 = int_to_ptr.hbm [resolvable:$true] %s298_s30 }
  0x2d   : > { %v1588_v1 = vld [vmem:[%s1847_s6] sm:$0x1]  ;;  %vm561_vm0 = vcmp.eq.s32.totalorder %v559_v3, 0  ;;  %s1600_s29 = sshll.u32 %s1442_s2, 4  ;;  %s1603_s10 = sld [smem:[#allocation7 + %s321_s18]]  ;;  %vm562_vm1 = vcmp.eq.s32.totalorder %v560_v5, 0 }
  0x2e   : > { %v1593_v2 = vld [vmem:[%s1848_s7] sm:$0x1]  ;;  %v565_v4 = vsel %vm561_vm0, 1, %v1440_v0  ;;  %1849 = sst [smem:[#allocation53_spill]] %s1600_s29  ;;  %s961_s28 = sshra.s32 %s299_s30, 4  ;;  %s962_s28 = int_to_ptr.hbm [resolvable:$true] %s961_s28 }
  0x2f   : > { %568 = vperm.xlu0 %900, %v565_v4   ;;  %s963_s9 = scalar_lea.hbm %s962_s28, 1  ;;  %p966_p2 = scmp.lt.s32.totalorder %s962_s28, %s1828_s3 }
  0x30   : > { %p964_p1 = scmp.ne.s32.totalorder %s962_s28, %s963_s9  ;;  %p967_p3 = scmp.lt.s32.totalorder %s1608_s20, %s963_s9 }
  0x32   : > { %p968_p5 = por %p967_p3, %p966_p2 }
  0x34   : > { %p969_p6 = pnand %p968_p5, %p964_p1 }
  0x36   : > { %972 = shalt.err (!%p969_p6)  }
  0x37   : > { %303 = dma.hbm_to_vmem [thread:$0]  %s299_s30, 16, %s301_s27, [#allocation5]  ;;  %v566_v6 = vsel %vm562_vm1, 1, %v1440_v0 }
  0x38   : > { %s306_s26 = scalar_lea.hbm %s1828_s3, %s305_s15  ;;  %s1443_s6 = smov [#allocation2 + $0x2]  }
  0x39   : > { %s315_s29 = sshll.u32 %s306_s26, 4  ;;  %s1617_s4 = sshll.u32 %s1443_s6, 4  ;;  %s316_s29 = int_to_ptr.hbm [resolvable:$true] %s315_s29  ;;  %s335_s4 = int_to_ptr.vmem [resolvable:$true] %s1617_s4 }
  0x3a   : > { %s985_s28 = sshra.s32 %s316_s29, 4  ;;  %s986_s28 = int_to_ptr.hbm [resolvable:$true] %s985_s28 }
  0x3b   : > { %s987_s9 = scalar_lea.hbm %s986_s28, 1  ;;  %p990_p9 = scmp.lt.s32.totalorder %s986_s28, %s1828_s3 }
  0x3c   : > { %p988_p7 = scmp.ne.s32.totalorder %s986_s28, %s987_s9  ;;  %p991_p10 = scmp.lt.s32.totalorder %s1608_s20, %s987_s9 }
  0x3e   : > { %p992_p11 = por %p991_p10, %p990_p9 }
  0x40   : > { %p993_p12 = pnand %p992_p11, %p988_p7 }
  0x42   : > { %996 = shalt.err (!%p993_p12)  }
  0x43   : > { %s1850_s15 = sld [smem:[#allocation53_spill]]  ;;  %s323_s2 = scalar_lea.hbm %s1828_s3, %s1603_s10  ;;  %571 = vperm.xlu0 %900, %v566_v6  }
  0x44   : > { %s338_s18 = sadd.s32 3, %s1575_s12  ;;  %s332_s22 = sshll.u32 %s323_s2, 4  ;;  %s333_s22 = int_to_ptr.hbm [resolvable:$true] %s332_s22 }
  0x45   : > { %s339_s26 = sld [smem:[#allocation7 + %s338_s18]]  ;;  %s1009_s28 = sshra.s32 %s333_s22, 4  ;;  %s1010_s28 = int_to_ptr.hbm [resolvable:$true] %s1009_s28 }
  0x46   : > { %s1011_s9 = scalar_lea.hbm %s1010_s28, 1  ;;  %p1014_p0 = scmp.lt.s32.totalorder %s1010_s28, %s1828_s3 }
  0x47   : > { %p1012_p13 = scmp.ne.s32.totalorder %s1010_s28, %s1011_s9  ;;  %p1015_p1 = scmp.lt.s32.totalorder %s1608_s20, %s1011_s9 }
  0x49   : > { %s1851_s6 = int_to_ptr.vmem [resolvable:$true] %s1850_s15  ;;  %p1016_p2 = por %p1015_p1, %p1014_p0 }
  0x4a   : > { %320 = dma.hbm_to_vmem [thread:$0]  %s316_s29, 16, %s1851_s6, [#allocation5] }
  0x4b   : > { %p1017_p3 = pnand %p1016_p2, %p1012_p13 }
  0x4d   : > { %1020 = shalt.err (!%p1017_p3)  }
  0x4e   : > { %337 = dma.hbm_to_vmem [thread:$0]  %s333_s22, 16, %s335_s4, [#allocation5] }
  0x4f   : > { %s1444_s29 = smov [#allocation2 + $0x3]   ;;  %s355_s15 = sadd.s32 4, %s1575_s12 }
  0x50   : > { %s351_s10 = sshll.u32 %s1444_s29, 4  ;;  %s356_s6 = sld [smem:[#allocation7 + %s355_s15]]  ;;  %s352_s10 = int_to_ptr.vmem [resolvable:$true] %s351_s10 }
  0x51   : > { %s340_s2 = scalar_lea.hbm %s1828_s3, %s339_s26  ;;  %s1445_s25 = smov [#allocation2 + $0x4]  }
  0x52   : > { %s349_s18 = sshll.u32 %s340_s2, 4  ;;  %s1640_s28 = sshll.u32 %s1445_s25, 4  ;;  %s350_s18 = int_to_ptr.hbm [resolvable:$true] %s349_s18  ;;  %s369_s28 = int_to_ptr.vmem [resolvable:$true] %s1640_s28 }
  0x53   : > { %s372_s9 = sadd.s32 5, %s1575_s12  ;;  %s1033_s27 = sshra.s32 %s350_s18, 4  ;;  %s1034_s27 = int_to_ptr.hbm [resolvable:$true] %s1033_s27 }
  0x54   : > { %s1035_s4 = scalar_lea.hbm %s1034_s27, 1  ;;  %p1038_p6 = scmp.lt.s32.totalorder %s1034_s27, %s1828_s3 }
  0x55   : > { %p1036_p5 = scmp.ne.s32.totalorder %s1034_s27, %s1035_s4  ;;  %p1039_p7 = scmp.lt.s32.totalorder %s1608_s20, %s1035_s4 }
  0x57   : > { %p1040_p9 = por %p1039_p7, %p1038_p6 }
  0x59   : > { %p1041_p10 = pnand %p1040_p9, %p1036_p5 }
  0x5b   : > { %1044 = shalt.err (!%p1041_p10)  }
  0x5c   : > { %354 = dma.hbm_to_vmem [thread:$0]  %s350_s18, 16, %s352_s10, [#allocation5] }
  0x5d   : > { %s373_s26 = sld [smem:[#allocation7 + %s372_s9]]  ;;  %s357_s30 = scalar_lea.hbm %s1828_s3, %s356_s6 }
  0x5e   : > { %s366_s17 = sshll.u32 %s357_s30, 4  ;;  %s1446_s2 = smov [#allocation2 + $0x5]   ;;  %s367_s17 = int_to_ptr.hbm [resolvable:$true] %s366_s17 }
  0x5f   : > { %s1651_s25 = sshll.u32 %s1446_s2, 4  ;;  %s1057_s7 = sshra.s32 %s367_s17, 4  ;;  %s386_s25 = int_to_ptr.vmem [resolvable:$true] %s1651_s25  ;;  %s1058_s7 = int_to_ptr.hbm [resolvable:$true] %s1057_s7 }
  0x60   : > { %s1059_s27 = scalar_lea.hbm %s1058_s7, 1  ;;  %p1062_p12 = scmp.lt.s32.totalorder %s1058_s7, %s1828_s3 }
  0x61   : > { %p1060_p11 = scmp.ne.s32.totalorder %s1058_s7, %s1059_s27  ;;  %p1063_p13 = scmp.lt.s32.totalorder %s1608_s20, %s1059_s27 }
  0x63   : > { %p1064_p0 = por %p1063_p13, %p1062_p12 }
  0x65   : > { %p1065_p1 = pnand %p1064_p0, %p1060_p11 }
  0x67   : > { %1068 = shalt.err (!%p1065_p1)  }
  0x68   : > { %371 = dma.hbm_to_vmem [thread:$0]  %s367_s17, 16, %s369_s28, [#allocation5] }
  0x69   : > { %s389_s6 = sadd.s32 6, %s1575_s12  ;;  %s374_s22 = scalar_lea.hbm %s1828_s3, %s373_s26 }
  0x6a   : > { %s390_s29 = sld [smem:[#allocation7 + %s389_s6]]  ;;  %s383_s15 = sshll.u32 %s374_s22, 4  ;;  %s384_s15 = int_to_ptr.hbm [resolvable:$true] %s383_s15 }
  0x6b   : > { %s1447_s30 = smov [#allocation2 + $0x6]   ;;  %s1081_s7 = sshra.s32 %s384_s15, 4  ;;  %s1082_s7 = int_to_ptr.hbm [resolvable:$true] %s1081_s7 }
  0x6c   : > { %s1662_s2 = sshll.u32 %s1447_s30, 4  ;;  %s1083_s27 = scalar_lea.hbm %s1082_s7, 1  ;;  %s403_s2 = int_to_ptr.vmem [resolvable:$true] %s1662_s2 }
  0x6d   : > { %p1084_p2 = scmp.ne.s32.totalorder %s1082_s7, %s1083_s27  ;;  %p1086_p3 = scmp.lt.s32.totalorder %s1082_s7, %s1828_s3 }
  0x6e   : > { %p1087_p5 = scmp.lt.s32.totalorder %s1608_s20, %s1083_s27 }
  0x70   : > { %p1088_p6 = por %p1087_p5, %p1086_p3 }
  0x72   : > { %p1089_p7 = pnand %p1088_p6, %p1084_p2 }
  0x74   : > { %1092 = shalt.err (!%p1089_p7)  }
  0x75   : > { %388 = dma.hbm_to_vmem [thread:$0]  %s384_s15, 16, %s386_s25, [#allocation5] }
  0x76   : > { %s406_s26 = sadd.s32 7, %s1575_s12  ;;  %s1448_s18 = smov [#allocation2 + $0x7]  }
  0x77   : > { %s407_s10 = sld [smem:[#allocation7 + %s406_s26]]  ;;  %s1670_s6 = sshll.u32 %s1448_s18, 4  ;;  %s420_s6 = int_to_ptr.vmem [resolvable:$true] %s1670_s6 }
  0x78   : > { %s391_s22 = scalar_lea.hbm %s1828_s3, %s390_s29  ;;  %s423_s7 = sadd.s32 8, %s1575_s12 }
  0x79   : > { %s400_s30 = sshll.u32 %s391_s22, 4  ;;  %s1677_s27 = sld [smem:[#allocation7 + %s423_s7]]  ;;  %s401_s30 = int_to_ptr.hbm [resolvable:$true] %s400_s30 }
  0x7a   : > { %s1105_s25 = sshra.s32 %s401_s30, 4  ;;  %s1106_s25 = int_to_ptr.hbm [resolvable:$true] %s1105_s25 }
  0x7b   : > { %s1107_s15 = scalar_lea.hbm %s1106_s25, 1  ;;  %p1110_p10 = scmp.lt.s32.totalorder %s1106_s25, %s1828_s3 }
  0x7c   : > { %p1108_p9 = scmp.ne.s32.totalorder %s1106_s25, %s1107_s15  ;;  %p1111_p11 = scmp.lt.s32.totalorder %s1608_s20, %s1107_s15 }
  0x7e   : > { %p1112_p12 = por %p1111_p11, %p1110_p10 }
  0x80   : > { %p1113_p13 = pnand %p1112_p12, %p1108_p9 }
  0x82   : > { %1116 = shalt.err (!%p1113_p13)  }
  0x83   : > { %405 = dma.hbm_to_vmem [thread:$0]  %s401_s30, 16, %s403_s2, [#allocation5] }
  0x84   : > { %s440_s29 = sadd.s32 9, %s1575_s12  ;;  %s408_s9 = scalar_lea.hbm %s1828_s3, %s407_s10 }
  0x85   : > { %s1449_s4 = smov [#allocation3]   ;;  %s417_s7 = sshll.u32 %s408_s9, 4  ;;  %s418_s7 = int_to_ptr.hbm [resolvable:$true] %s417_s7 }
  0x86   : > { %s1689_s22 = sshll.u32 %s1449_s4, 4  ;;  %s1692_s25 = sld [smem:[#allocation7 + %s440_s29]]  ;;  %s437_s22 = int_to_ptr.vmem [resolvable:$true] %s1689_s22 }
  0x87   : > { %s1129_s15 = sshra.s32 %s418_s7, 4  ;;  %s1130_s15 = int_to_ptr.hbm [resolvable:$true] %s1129_s15 }
  0x88   : > { %s1131_s28 = scalar_lea.hbm %s1130_s15, 1  ;;  %p1134_p1 = scmp.lt.s32.totalorder %s1130_s15, %s1828_s3 }
  0x89   : > { %p1132_p0 = scmp.ne.s32.totalorder %s1130_s15, %s1131_s28  ;;  %p1135_p2 = scmp.lt.s32.totalorder %s1608_s20, %s1131_s28 }
  0x8b   : > { %p1136_p3 = por %p1135_p2, %p1134_p1 }
  0x8d   : > { %p1137_p5 = pnand %p1136_p3, %p1132_p0 }
  0x8f   : > { %1140 = shalt.err (!%p1137_p5)  }
  0x90   : > { %422 = dma.hbm_to_vmem [thread:$0]  %s418_s7, 16, %s420_s6, [#allocation5] }
  0x91   : > { %s425_s29 = scalar_lea.hbm %s1828_s3, %s1677_s27  ;;  %s1450_s18 = smov [#allocation3 + $0x1]  }
  0x92   : > { %s434_s26 = sshll.u32 %s425_s29, 4  ;;  %s453_s9 = sshll.u32 %s1450_s18, 4  ;;  %s435_s26 = int_to_ptr.hbm [resolvable:$true] %s434_s26  ;;  %s454_s9 = int_to_ptr.vmem [resolvable:$true] %s453_s9 }
  0x93   : > { %s1153_s4 = sshra.s32 %s435_s26, 4  ;;  %s1154_s4 = int_to_ptr.hbm [resolvable:$true] %s1153_s4 }
  0x94   : > { %s1155_s15 = scalar_lea.hbm %s1154_s4, 1  ;;  %p1158_p7 = scmp.lt.s32.totalorder %s1154_s4, %s1828_s3 }
  0x95   : > { %p1156_p6 = scmp.ne.s32.totalorder %s1154_s4, %s1155_s15  ;;  %p1159_p9 = scmp.lt.s32.totalorder %s1608_s20, %s1155_s15 }
  0x97   : > { %p1160_p10 = por %p1159_p9, %p1158_p7 }
  0x99   : > { %p1161_p11 = pnand %p1160_p10, %p1156_p6 }
  0x9b   : > { %1164 = shalt.err (!%p1161_p11)  }
  0x9c   : > { %439 = dma.hbm_to_vmem [thread:$0]  %s435_s26, 16, %s437_s22, [#allocation5 + $0x1] }
  0x9d   : > { %s442_s7 = scalar_lea.hbm %s1828_s3, %s1692_s25  ;;  %s457_s2 = sadd.s32 10, %s1575_s12 }
  0x9e   : > { %s451_s10 = sshll.u32 %s442_s7, 4  ;;  %s458_s30 = sld [smem:[#allocation7 + %s457_s2]]  ;;  %s452_s10 = int_to_ptr.hbm [resolvable:$true] %s451_s10 }
  0x9f   : > { %s1177_s29 = sshra.s32 %s452_s10, 4  ;;  %s1178_s29 = int_to_ptr.hbm [resolvable:$true] %s1177_s29 }
  0xa0   : > { %s1179_s18 = scalar_lea.hbm %s1178_s29, 1  ;;  %p1182_p13 = scmp.lt.s32.totalorder %s1178_s29, %s1828_s3 }
  0xa1   : > { %p1180_p12 = scmp.ne.s32.totalorder %s1178_s29, %s1179_s18  ;;  %p1183_p0 = scmp.lt.s32.totalorder %s1608_s20, %s1179_s18 }
  0xa3   : > { %p1184_p1 = por %p1183_p0, %p1182_p13 }
  0xa5   : > { %p1185_p2 = pnand %p1184_p1, %p1180_p12 }
  0xa7   : > { %1188 = shalt.err (!%p1185_p2)  }
  0xa8   : > { %456 = dma.hbm_to_vmem [thread:$0]  %s452_s10, 16, %s454_s9, [#allocation5 + $0x1] }
  0xa9   : > { %s1451_s22 = smov [#allocation3 + $0x2]   ;;  %s474_s26 = sadd.s32 11, %s1575_s12 }
  0xaa   : > { %s470_s25 = sshll.u32 %s1451_s22, 4  ;;  %s475_s28 = sld [smem:[#allocation7 + %s474_s26]]  ;;  %s471_s25 = int_to_ptr.vmem [resolvable:$true] %s470_s25 }
  0xab   : > { %s491_s17 = sadd.s32 12, %s1575_s12  ;;  %s459_s7 = scalar_lea.hbm %s1828_s3, %s458_s30 }
  0xac   : > { %s1452_s2 = smov [#allocation3 + $0x3]   ;;  %s468_s18 = sshll.u32 %s459_s7, 4  ;;  %s469_s18 = int_to_ptr.hbm [resolvable:$true] %s468_s18 }
  0xad   : > { %s1722_s29 = sshll.u32 %s1452_s2, 4  ;;  %s1725_s9 = sld [smem:[#allocation7 + %s491_s17]]  ;;  %s488_s29 = int_to_ptr.vmem [resolvable:$true] %s1722_s29 }
  0xae   : > { %s1201_s10 = sshra.s32 %s469_s18, 4  ;;  %s1202_s10 = int_to_ptr.hbm [resolvable:$true] %s1201_s10 }
  0xaf   : > { %s1203_s4 = scalar_lea.hbm %s1202_s10, 1  ;;  %p1206_p5 = scmp.lt.s32.totalorder %s1202_s10, %s1828_s3 }
  0xb0   : > { %p1204_p3 = scmp.ne.s32.totalorder %s1202_s10, %s1203_s4  ;;  %p1207_p6 = scmp.lt.s32.totalorder %s1608_s20, %s1203_s4 }
  0xb2   : > { %p1208_p7 = por %p1207_p6, %p1206_p5 }
  0xb4   : > { %p1209_p9 = pnand %p1208_p7, %p1204_p3 }
  0xb6   : > { %1212 = shalt.err (!%p1209_p9)  }
  0xb7   : > { %473 = dma.hbm_to_vmem [thread:$0]  %s469_s18, 16, %s471_s25, [#allocation5 + $0x1] }
  0xb8   : > { %s476_s6 = scalar_lea.hbm %s1828_s3, %s475_s28  ;;  %s1453_s27 = smov [#allocation3 + $0x4]  }
  0xb9   : > { %s485_s17 = sshll.u32 %s476_s6, 4  ;;  %s504_s7 = sshll.u32 %s1453_s27, 4  ;;  %s486_s17 = int_to_ptr.hbm [resolvable:$true] %s485_s17  ;;  %s505_s7 = int_to_ptr.vmem [resolvable:$true] %s504_s7 }
  0xba   : > { %s1225_s2 = sshra.s32 %s486_s17, 4  ;;  %s1226_s2 = int_to_ptr.hbm [resolvable:$true] %s1225_s2 }
  0xbb   : > { %s1227_s19 = scalar_lea.hbm %s1226_s2, 1  ;;  %p1230_p11 = scmp.lt.s32.totalorder %s1226_s2, %s1828_s3 }
  0xbc   : > { %p1228_p10 = scmp.ne.s32.totalorder %s1226_s2, %s1227_s19  ;;  %p1231_p12 = scmp.lt.s32.totalorder %s1608_s20, %s1227_s19 }
  0xbe   : > { %p1232_p13 = por %p1231_p12, %p1230_p11 }
  0xc0   : > { %p1233_p0 = pnand %p1232_p13, %p1228_p10 }
  0xc2   : > { %1236 = shalt.err (!%p1233_p0)  }
  0xc3   : > { %490 = dma.hbm_to_vmem [thread:$0]  %s486_s17, 16, %s488_s29, [#allocation5 + $0x1] }
  0xc4   : > { %s493_s18 = scalar_lea.hbm %s1828_s3, %s1725_s9  ;;  %s508_s15 = sadd.s32 13, %s1575_s12 }
  0xc5   : > { %s502_s22 = sshll.u32 %s493_s18, 4  ;;  %s509_s30 = sld [smem:[#allocation7 + %s508_s15]]  ;;  %s503_s22 = int_to_ptr.hbm [resolvable:$true] %s502_s22 }
  0xc6   : > { %s1249_s26 = sshra.s32 %s503_s22, 4  ;;  %s1250_s26 = int_to_ptr.hbm [resolvable:$true] %s1249_s26 }
  0xc7   : > { %s1251_s6 = scalar_lea.hbm %s1250_s26, 1  ;;  %p1254_p2 = scmp.lt.s32.totalorder %s1250_s26, %s1828_s3 }
  0xc8   : > { %p1252_p1 = scmp.ne.s32.totalorder %s1250_s26, %s1251_s6  ;;  %p1255_p3 = scmp.lt.s32.totalorder %s1608_s20, %s1251_s6 }
  0xca   : > { %p1256_p5 = por %p1255_p3, %p1254_p2 }
  0xcc   : > { %p1257_p6 = pnand %p1256_p5, %p1252_p1 }
  0xce   : > { %1260 = shalt.err (!%p1257_p6)  }
  0xcf   : > { %507 = dma.hbm_to_vmem [thread:$0]  %s503_s22, 16, %s505_s7, [#allocation5 + $0x1] }
  0xd0   : > { %s1454_s29 = smov [#allocation3 + $0x5]   ;;  %s525_s17 = sadd.s32 14, %s1575_s12 }
  0xd1   : > { %s521_s9 = sshll.u32 %s1454_s29, 4  ;;  %s526_s2 = sld [smem:[#allocation7 + %s525_s17]]  ;;  %s522_s9 = int_to_ptr.vmem [resolvable:$true] %s521_s9 }
  0xd2   : > { %s542_s10 = sadd.s32 15, %s1575_s12  ;;  %s510_s28 = scalar_lea.hbm %s1828_s3, %s509_s30 }
  0xd3   : > { %s1455_s18 = smov [#allocation3 + $0x6]   ;;  %s519_s26 = sshll.u32 %s510_s28, 4  ;;  %s520_s26 = int_to_ptr.hbm [resolvable:$true] %s519_s26 }
  0xd4   : > { %s1752_s15 = sshll.u32 %s1455_s18, 4  ;;  %s543_s7 = sld [smem:[#allocation7 + %s542_s10]]  ;;  %s539_s15 = int_to_ptr.vmem [resolvable:$true] %s1752_s15 }
  0xd5   : > { %s1273_s22 = sshra.s32 %s520_s26, 4  ;;  %s1274_s22 = int_to_ptr.hbm [resolvable:$true] %s1273_s22 }
  0xd6   : > { %s1275_s6 = scalar_lea.hbm %s1274_s22, 1  ;;  %p1278_p9 = scmp.lt.s32.totalorder %s1274_s22, %s1828_s3 }
  0xd7   : > { %p1276_p7 = scmp.ne.s32.totalorder %s1274_s22, %s1275_s6  ;;  %p1279_p10 = scmp.lt.s32.totalorder %s1608_s20, %s1275_s6 }
  0xd9   : > { %p1280_p11 = por %p1279_p10, %p1278_p9 }
  0xdb   : > { %p1281_p12 = pnand %p1280_p11, %p1276_p7 }
  0xdd   : > { %1284 = shalt.err (!%p1281_p12)  }
  0xde   : > { %524 = dma.hbm_to_vmem [thread:$0]  %s520_s26, 16, %s522_s9, [#allocation5 + $0x1] }
  0xdf   : > { %s527_s17 = scalar_lea.hbm %s1828_s3, %s526_s2  ;;  %s1456_s10 = smov [#allocation3 + $0x7]  }
  0xe0   : > { %s536_s4 = sshll.u32 %s527_s17, 4  ;;  %s555_s25 = sshll.u32 %s1456_s10, 4  ;;  %s537_s4 = int_to_ptr.hbm [resolvable:$true] %s536_s4  ;;  %s556_s25 = int_to_ptr.vmem [resolvable:$true] %s555_s25 }
  0xe1   : > { %s1297_s28 = sshra.s32 %s537_s4, 4  ;;  %s1298_s28 = int_to_ptr.hbm [resolvable:$true] %s1297_s28 }
  0xe2   : > { %s1299_s18 = scalar_lea.hbm %s1298_s28, 1  ;;  %p1302_p0 = scmp.lt.s32.totalorder %s1298_s28, %s1828_s3 }
  0xe3   : > { %p1300_p13 = scmp.ne.s32.totalorder %s1298_s28, %s1299_s18  ;;  %p1303_p1 = scmp.lt.s32.totalorder %s1608_s20, %s1299_s18 }
  0xe5   : > { %p1304_p2 = por %p1303_p1, %p1302_p0 }
  0xe7   : > { %p1305_p3 = pnand %p1304_p2, %p1300_p13 }
  0xe9   : > { %1308 = shalt.err (!%p1305_p3)  }
  0xea   : > { %541 = dma.hbm_to_vmem [thread:$0]  %s537_s4, 16, %s539_s15, [#allocation5 + $0x1] }
  0xeb   : > { %s544_s2 = scalar_lea.hbm %s1828_s3, %s543_s7 }
  0xec   : > { %s553_s6 = sshll.u32 %s544_s2, 4  ;;  %s554_s6 = int_to_ptr.hbm [resolvable:$true] %s553_s6 }
  0xed   : > { %s1321_s27 = sshra.s32 %s554_s6, 4  ;;  %s1322_s27 = int_to_ptr.hbm [resolvable:$true] %s1321_s27 }
  0xee   : > { %s1323_s30 = scalar_lea.hbm %s1322_s27, 1  ;;  %p1326_p6 = scmp.lt.s32.totalorder %s1322_s27, %s1828_s3 }
  0xef   : > { %p1324_p5 = scmp.ne.s32.totalorder %s1322_s27, %s1323_s30  ;;  %p1327_p7 = scmp.lt.s32.totalorder %s1608_s20, %s1323_s30 }
  0xf1   : > { %p1328_p9 = por %p1327_p7, %p1326_p6 }
  0xf3   : > { %p1329_p10 = pnand %p1328_p9, %p1324_p5 }
  0xf5   : > { %1332 = shalt.err (!%p1329_p10)  }
  0xf6   : > { %558 = dma.hbm_to_vmem [thread:$0]  %s554_s6, 16, %s556_s25, [#allocation5 + $0x1]  ;;  %v901_v7 = vld [vmem:[%s1830_s5] ss:$0 sm:$0xff]  ;;  %v902_v8 = vld [vmem:[%s1830_s5 + $0x1] ss:$0 sm:$0xff]  ;;  %v569_v10 = vpop.permute.xlu0 %568 }
  0xf7   : > { %s579_s15 = sld [smem:[#allocation8 + %s1575_s12]]  ;;  %vm573_vm2 = vcmp.eq.s32.totalorder %v569_v10, 1  ;;  %s1781_s20 = scalar_lea.vmem [#allocation12], %s1572_s11 }
  0xf8   : > { %v577_v11 = vsel %vm573_vm2, %v901_v7, %v902_v8 }
  0xfd   : > { %s580_s18 = scalar_lea.vmem [#allocation9], %s579_s15 }
  0xfe   : > { %v581_v9 = vld [vmem:[%s580_s18] sm:$0xff]  ;;  %v582_v13 = vld [vmem:[%s580_s18 + $0x8] sm:$0xff]  ;;  %v572_v14 = vpop.permute.xlu0 %571 }
  0xff   : > { %v583_v12 = vadd.f32 %v581_v9, %v577_v11  ;;  %vm574_vm3 = vcmp.eq.s32.totalorder %v572_v14, 1 }
 0x100   : > { %v578_v15 = vsel %vm574_vm3, %v901_v7, %v902_v8 }
 0x101   : > { %v584_v16 = vadd.f32 %v582_v13, %v578_v15 }
 0x102   : > { %1403 = dma.done.wait [#allocation5], 128 }
 0x103   : > { %1404 = vsyncadd [#allocation5], 4294967168  ;;  %v592_v17 = vld [vmem:[#allocation2] sm:$0xff]  ;;  %v616_v32 = vperm.slane %v1588_v1, 0  ;;  %v620_v34 = vperm.slane %v1593_v2, 0 }
 0x104   : > { %v594_v18 = vadd.f32 %v592_v17, %v583_v12 }
 0x106   : > { %595 = vadd.xlane.f32.xlu0 %v594_v18 }
 0x179   : > { %v596_v19 = vpop.xlane.xlu0 %595 }
 0x17a   : > { %v597_v20 = vmul.f32 0.0078125, %v596_v19 }
 0x17c   : > { %v598_v21 = vsub.f32 %v594_v18, %v597_v20 }
 0x17e   : > { %v599_v22 = vmul.f32 %v598_v21, %v598_v21 }
 0x180   : > { %600 = vadd.xlane.f32.xlu0 %v599_v22 }
 0x1f3   : > { %v601_v23 = vpop.xlane.xlu0 %600 }
 0x1f4   : > { %v602_v24 = vmul.f32 0.0078125, %v601_v23 }
 0x1f6   : > { %v603_v25 = vadd.f32 1e-12, %v602_v24 }
 0x1f8   : > { %903 = vrsqrt.f32 %v603_v25  ;;  %vm610_vm5 = vweird.f32 %v603_v25 }
 0x1fe   : > { %v904_v26 = vpop.eup %903 }
 0x1ff   : > { %v605_v27 = vmul.f32 %v904_v26, %v603_v25  ;;  %vm611_vm4 = vweird.f32 %v904_v26 }
 0x200   : > { %vm612_vm6 = vmor %vm610_vm5, %vm611_vm4 }
 0x201   : > { %v606_v28 = vmul.f32 %v904_v26, %v605_v27 }
 0x203   : > { %v607_v29 = vmul.f32 0.5, %v606_v28 }
 0x205   : > { %v608_v30 = vsub.f32 1.5, %v607_v29 }
 0x207   : > { %v609_v31 = vmul.f32 %v904_v26, %v608_v30 }
 0x209   : > { %v613_v33 = vsel %vm612_vm6, %v904_v26, %v609_v31 }
 0x20a   : > { %v614_v35 = vmul.f32 %v613_v33, %v598_v21 }
 0x20c   : > { %v618_v36 = vmul.f32 %v616_v32, %v614_v35 }
 0x20e   : > { %v622_v37 = vadd.f32 %v620_v34, %v618_v36 }
 0x210   : > { %623 = vst [vmem:[%s1781_s20] sm:$0xff] %v622_v37 }
 0x211   : > { %1405 = dma.done.wait [#allocation5 + $0x1], 128 }
 0x212   : > { %1406 = vsyncadd [#allocation5 + $0x1], 4294967168  ;;  %v626_v38 = vld [vmem:[#allocation3] sm:$0xff]  ;;  %s666_s19 = scalar_lea.hbm %s1833_s8, %s1575_s12  ;;  %s667_s22 = sshll.u32 %s1781_s20, 4  ;;  %s668_s22 = int_to_ptr.vmem [resolvable:$true] %s667_s22 }
 0x213   : > { %v628_v39 = vadd.f32 %v626_v38, %v584_v16  ;;  %s669_s9 = sshll.u32 %s666_s19, 4  ;;  %s1852_s26 = sand.u32 1, %s1417_s14   ;;  %s670_s9 = int_to_ptr.hbm [resolvable:$true] %s669_s9 }
 0x214   : > { %s653_s2 = scalar_lea.sflag [#allocation11], %s1852_s26  ;;  %s1359_s6 = sshra.s32 %s670_s9, 4  ;;  %s1360_s6 = int_to_ptr.hbm [resolvable:$true] %s1359_s6 }
 0x215   : > { %629 = vadd.xlane.f32.xlu0 %v628_v39  ;;  %s1361_s27 = scalar_lea.hbm %s1360_s6, 16  ;;  %s1365_s29 = scalar_lea.hbm %s1833_s8, 32 }
 0x216   : > { %p1362_p11 = scmp.ne.s32.totalorder %s1360_s6, %s1361_s27  ;;  %p1366_p0 = scmp.lt.s32.totalorder %s1360_s6, %s1833_s8 }
 0x217   : > { %p1367_p1 = scmp.lt.s32.totalorder %s1365_s29, %s1361_s27 }
 0x218   : > { %p1363_p12 = pnand %p1362_p11, %p1550_p4 }
 0x219   : > { %p1368_p2 = por %p1367_p1, %p1366_p0 }
 0x21a   : > { %p1364_p13 = pneg %p1363_p12 }
 0x21c   : > { %p1369_p3 = pnand %p1368_p2, %p1364_p13 }
 0x288   : > { %v630_v40 = vpop.xlane.xlu0 %629 }
 0x289   : > { %v631_v41 = vmul.f32 0.0078125, %v630_v40 }
 0x28b   : > { %v632_v42 = vsub.f32 %v628_v39, %v631_v41 }
 0x28d   : > { %v633_v43 = vmul.f32 %v632_v42, %v632_v42 }
 0x28f   : > { %634 = vadd.xlane.f32.xlu0 %v633_v43 }
 0x302   : > { %v635_v44 = vpop.xlane.xlu0 %634 }
 0x303   : > { %v636_v45 = vmul.f32 0.0078125, %v635_v44 }
 0x305   : > { %v637_v46 = vadd.f32 1e-12, %v636_v45 }
 0x307   : > { %905 = vrsqrt.f32 %v637_v46  ;;  %vm644_vm8 = vweird.f32 %v637_v46 }
 0x30d   : > { %v906_v47 = vpop.eup %905 }
 0x30e   : > { %v639_v48 = vmul.f32 %v906_v47, %v637_v46  ;;  %vm645_vm7 = vweird.f32 %v906_v47 }
 0x30f   : > { %vm646_vm9 = vmor %vm644_vm8, %vm645_vm7 }
 0x310   : > { %v640_v49 = vmul.f32 %v906_v47, %v639_v48 }
 0x312   : > { %v641_v50 = vmul.f32 0.5, %v640_v49 }
 0x314   : > { %v642_v51 = vsub.f32 1.5, %v641_v50 }
 0x316   : > { %v643_v52 = vmul.f32 %v906_v47, %v642_v51 }
 0x318   : > { %v647_v53 = vsel %vm646_vm9, %v906_v47, %v643_v52 }
 0x319   : > { %v648_v54 = vmul.f32 %v647_v53, %v632_v42 }
 0x31b   : > { %v649_v55 = vmul.f32 %v648_v54, %v616_v32 }
 0x31d   : > { %v650_v56 = vadd.f32 %v649_v55, %v620_v34 }
 0x31f   : > { %651 = vst [vmem:[%s1781_s20 + $0x8] sm:$0xff] %v650_v56 }
 0x320   : > { %1372 = shalt.err (!%p1369_p3)
}
 0x321   : > { %s1457_s7 = smov 128   ;;  %s1458_s4 = smov 8  }
 0x322   : > { %815 = dma.vmem_to_hbm [thread:$0]  (%p1550_p4), %s668_s22, 256, %s670_s9, %s653_s2, %s1457_s7, %s1457_s7, %s1458_s4  }
 0x323 PF: > { %p827_p5 = scmp.ge.s32.totalorder %s1433_s16, 2  ;;  %s684_s10 = sand.u32 1, %s1413_s13  }
 0x324   : > { %s685_s28 = scalar_lea.sflag [#allocation11], %s684_s10 }
 0x325   : > { %p822_p6 = pnand %p827_p5, %p1557_p8 }
 0x327   : > { %p823_p7 = pneg %p822_p6 }
 0x329   : > { %1408 = dma.done.wait (%p823_p7), %s685_s28, 256  }
 0x32a   : > { %1410 = vsyncadd (%p823_p7), %s685_s28, 4294967040  ;;  %s35_s16 = sadd.s32 1, %s1433_s16   ;;  %s1853_s21 = sld [smem:[#allocation52_spill]] }
 0x32b   : > { %p32_p9 = scmp.ge.s32.totalorder %s35_s16, 4   ;;  %s1854_s13 = smov %s1417_s14 }
 0x32c   : > { %s1855_s14 = smov %s1421_s0  ;;  %s1856_s0 = smov %s1563_s24 }
 0x32d   : > { %s1857_s15 = smov %s1429_s1  ;;  %34 = sbr.rel (!%p32_p9) target bundleno = 15 (0xf), region = 177 }
 0x330   : > { %s1858_s1 = smov %s1853_s21 }
 0x332   :  { %691 = vsyncpa [#allocation10], 1 }
 0x333   :  { %693 = vsyncpa [#allocation10 + $0x1], 1 }
 0x334   :  { %694 = vsyncpa [#allocation11], 1 }
 0x335   :  { %696 = vsyncpa [#allocation11 + $0x1], 1 }
 0x336   :  { %697 = vsyncmov [#allocation5] }
 0x339   :  { %s698_s23 = vpop.sfrf %697 }
 0x33a   :  { %p807_p4 = scmp.ne.s32.totalorder %s698_s23, 0 }
 0x33c   :  { %702 = shalt.err (%p807_p4)  }
 0x33d   :  { %704 = vsyncmov [#allocation5 + $0x1] }
 0x340   :  { %s705_s18 = vpop.sfrf %704 }
 0x341   :  { %p808_p8 = scmp.ne.s32.totalorder %s705_s18, 0 }
 0x343   :  { %709 = shalt.err (%p808_p8)  }

</bundles_post_ra>
